<compile_context>
chip_gen: v6e
topology: v6e:2x2x1
jax: 0.10.0
libtpu: 0.0.40
codegen_flags: <defaults>
</compile_context>

<pallas_src>
import functools
import math

import jax
import jax.numpy as jnp
from jax.experimental import pallas as pl
from jax.experimental.pallas import tpu as pltpu


def _round_up(x, m):
    return ((x + m - 1) // m) * m


def _encoder_kernel(x_ref, *refs, n_layers):
    """Fused MLP over one batch tile: ((x @ W0 + b0).relu() @ W1 + b1) ... ."""
    w_refs = refs[0:2 * n_layers:2]
    b_refs = refs[1:2 * n_layers:2]
    o_ref = refs[2 * n_layers]

    h = x_ref[...]                           # (tm, 784) in the compute dtype
    for i in range(n_layers):                # static unroll over the layer stack
        y = jnp.dot(h, w_refs[i][...], preferred_element_type=jnp.float32)
        y = y + b_refs[i][...]               # (1, N_pad) f32 bias broadcasts over rows
        if i < n_layers - 1:
            # f32 ReLU epilogue, then cast back to the compute dtype so the next
            # dot is full-rate bf16 x bf16 (and the intermediate is half-size)
            # when compute_dtype == bfloat16.  No-op cast in the f32 path.
            h = jnp.maximum(y, 0.0).astype(x_ref.dtype)
        else:
            o_ref[...] = y.astype(o_ref.dtype)


def _default_tm(batch_rows):
    """Batch-tile (M) size: sublane granule for tiny batches, 128-multiples
    otherwise, >=2 grid steps once batch >= 256 (v7x dual-TC sharding)."""
    if batch_rows <= 128:
        return _round_up(batch_rows, 8)
    if batch_rows <= 512:
        return 128
    if batch_rows <= 2048:
        return 256
    return 512


def lin_encoder_forward(x2d, padded_params, *, latent_dim, tm=None):
    """x2d: (B, input_dim).  padded_params: [(W_pad, b_pad)] lane-padded."""
    B, K = x2d.shape
    n_layers = len(padded_params)
    N_pad = padded_params[-1][0].shape[1]

    if tm is None:
        tm = _default_tm(B)
    grid = pl.cdiv(B, tm)        # partial last tile; no batch padding needed

    # x: tiled over the batch only; last dim is the full 784-wide extent.
    in_specs = [pl.BlockSpec((tm, K), lambda i: (i, 0))]
    args = [x2d]
    for w, b in padded_params:
        # Full-array blocks with a constant index_map -> weights/biases stay
        # VMEM resident across all grid steps (DMA'd exactly once).
        in_specs.append(pl.BlockSpec(w.shape, lambda i: (0, 0)))
        in_specs.append(pl.BlockSpec(b.shape, lambda i: (0, 0)))
        args.append(w)
        args.append(b)

    flops = 2 * grid * tm * sum(w.shape[0] * w.shape[1]
                                for w, _ in padded_params)
    bytes_accessed = (
        x2d.size * x2d.dtype.itemsize
        + sum(w.size * w.dtype.itemsize + b.size * b.dtype.itemsize
              for w, b in padded_params)
        + B * N_pad * 4)

    out = pl.pallas_call(
        functools.partial(_encoder_kernel, n_layers=n_layers),
        out_shape=jax.ShapeDtypeStruct((B, N_pad), jnp.float32),
        grid=(grid,),
        in_specs=in_specs,
        out_specs=pl.BlockSpec((tm, N_pad), lambda i: (i, 0)),
        compiler_params=pltpu.CompilerParams(
            dimension_semantics=("parallel",)),
        cost_estimate=pl.CostEstimate(
            flops=flops, transcendentals=0, bytes_accessed=bytes_accessed),
    )(*args)

    # Drop lane padding on the latent (output rows are exactly B already).
    return out[:, :latent_dim]


def _encoder_forward(x, padded_params, *, input_dim, latent_dim, compute_dtype):
    h = x.reshape(-1, input_dim).astype(compute_dtype)
    return lin_encoder_forward(h, padded_params, latent_dim=latent_dim)


class LinEncoderPallas:
    """JAX/Pallas re-implementation of LinEncoder's forward pass."""

    def __init__(self, input_dim, latent_dim, n_layers, key,
                 compute_dtype=jnp.bfloat16):
        # compute_dtype=bfloat16 (default): halves weight DMA/VMEM and runs the
        # MXU at full bf16 rate on v5e/v6e/v7x (f32 accumulation, f32 bias/ReLU
        # epilogue).  Pass compute_dtype=jnp.float32 for bit-strict numerics.
        ae_step_size = (input_dim - latent_dim) // n_layers
        dims = [input_dim]
        for i in range(n_layers - 1):
            dims.append(input_dim - (i + 1) * ae_step_size)
        dims.append(latent_dim)

        self.params = []          # unpadded (w, b), matches the PyTorch layout
        self.padded_params = []   # lane-padded copies used by the fused kernel
        for i in range(n_layers):
            d_in, d_out = dims[i], dims[i + 1]
            key, kw, kb = jax.random.split(key, 3)
            bound = 1.0 / math.sqrt(d_in)     # mimics PyTorch Linear init
            w = jax.random.uniform(kw, (d_in, d_out), jnp.float32, -bound, bound)
            b = jax.random.uniform(kb, (d_out,), jnp.float32, -bound, bound)
            self.params.append((w, b))

            # Layer 0 keeps its true in-dim (784 = 98 sublanes -> no x repack);
            # deeper layers see the previous layer's 128-padded width.  Out
            # dims are always padded to 128-lane multiples (lane-dense stores).
            # Zero padding (never random): padded positions stay exactly 0
            # through matmul + bias + ReLU, so results match unpadded math.
            d_in_p = d_in if i == 0 else _round_up(d_in, 128)
            d_out_p = _round_up(d_out, 128)
            w_p = jnp.zeros((d_in_p, d_out_p), compute_dtype)
            w_p = w_p.at[:d_in, :d_out].set(w.astype(compute_dtype))
            b_p = jnp.zeros((1, d_out_p), jnp.float32).at[0, :d_out].set(b)
            self.padded_params.append((w_p, b_p))

        self.n_layers = n_layers
        self.input_dim = input_dim
        self.latent_dim = latent_dim
        self.compute_dtype = compute_dtype

        # One jitted dispatch: reshape + cast + pallas_call + latent slice all
        # compile into a single executable (host dispatch of several XLA ops
        # dominated wall-clock for tiny batches).
        self._forward = jax.jit(functools.partial(
            _encoder_forward, input_dim=input_dim, latent_dim=latent_dim,
            compute_dtype=compute_dtype))

    def __call__(self, x):
        # forward: self.encoder(x.view(-1, 784)); dropout_in / dropout are
        # Identity (p == 0).
        return self._forward(x, self.padded_params)


if __name__ == "__main__":
    key = jax.random.PRNGKey(0)
    key, k_in = jax.random.split(key)

    # x.view(-1, 784) in the reference forward implies 784 features per sample.
    B = 2
    x = jax.random.normal(k_in, (B, 1, 28, 28), jnp.float32)  # NCHW

    input_dim = 784
    latent_dim = 32
    n_layers = 2  # dims: 784 -> 408 -> 32

    # Plain-JAX f32 reference using the unpadded parameters.
    enc_f32 = LinEncoderPallas(input_dim, latent_dim, n_layers, key,
                               compute_dtype=jnp.float32)
    h_ref = x.reshape(-1, input_dim)
    for i, (w, b) in enumerate(enc_f32.params):
        h_ref = h_ref @ w + b
        if i < n_layers - 1:
            h_ref = jnp.maximum(h_ref, 0.0)

    # 1) Strict-precision path (f32 weights/activations): exact kernel check.
    z_f32 = enc_f32(x)
    jax.block_until_ready(z_f32)
    assert z_f32.shape == (B, latent_dim)
    assert jnp.allclose(z_f32, h_ref, atol=1e-4, rtol=1e-4)

    # 2) Default perf path (bf16 weights/activations, f32 accumulation): same
    #    weights (same key), looser tolerance for bf16 input/weight rounding.
    enc_bf16 = LinEncoderPallas(input_dim, latent_dim, n_layers, key)
    z_bf16 = enc_bf16(x)
    jax.block_until_ready(z_bf16)
    assert z_bf16.shape == (B, latent_dim)
    assert jnp.allclose(z_bf16, h_ref, atol=3e-2, rtol=3e-2)

    print("KERNEL_OK")
</pallas_src>

<mosaic_0001>
module attributes {stable_mosaic.version = 11 : i64} {
  func.func @_encoder_kernel(%arg0: i32, %arg1: memref<8x784xf32, #tpu.memory_space<vmem>>, %arg2: memref<784x512xf32, #tpu.memory_space<vmem>>, %arg3: memref<1x512xf32, #tpu.memory_space<vmem>>, %arg4: memref<512x128xf32, #tpu.memory_space<vmem>>, %arg5: memref<1x128xf32, #tpu.memory_space<vmem>>, %arg6: memref<8x128xf32, #tpu.memory_space<vmem>>) attributes {dimension_semantics = [#tpu.dimension_semantics<parallel>], iteration_bounds = array<i64: 1>, scalar_prefetch = 0 : i64, scratch_operands = 0 : i64, tpu.core_type = #tpu.core_type<tc>, window_params = [{transform_indices = @transform_0, window_bounds = array<i64: 8, 784>}, {pipeline_mode = #tpu.pipeline_mode<synchronous>, transform_indices = @transform_1, window_bounds = array<i64: 784, 512>}, {pipeline_mode = #tpu.pipeline_mode<synchronous>, transform_indices = @transform_2, window_bounds = array<i64: 1, 512>}, {pipeline_mode = #tpu.pipeline_mode<synchronous>, transform_indices = @transform_3, window_bounds = array<i64: 512, 128>}, {pipeline_mode = #tpu.pipeline_mode<synchronous>, transform_indices = @transform_4, window_bounds = array<i64: 1, 128>}, {transform_indices = @transform_5, window_bounds = array<i64: 8, 128>}]} {
    %c0 = arith.constant 0 : index
    %c0_0 = arith.constant 0 : index
    %0 = vector.load %arg1[%c0, %c0_0] : memref<8x784xf32, #tpu.memory_space<vmem>>, vector<8x784xf32>
    %c0_1 = arith.constant 0 : index
    %c0_2 = arith.constant 0 : index
    %1 = vector.load %arg2[%c0_1, %c0_2] : memref<784x512xf32, #tpu.memory_space<vmem>>, vector<784x512xf32>
    %cst = arith.constant dense<0.000000e+00> : vector<8x512xf32>
    %2 = tpu.matmul %0, %1, %cst {dimension_numbers = #tpu.dot_dimension_numbers<[1], [0], [0], [1], [0, 0, 1, 1], [], []>} : vector<8x784xf32>, vector<784x512xf32>, vector<8x512xf32> -> vector<8x512xf32>
    %c0_3 = arith.constant 0 : index
    %c0_4 = arith.constant 0 : index
    %3 = vector.load %arg3[%c0_3, %c0_4] : memref<1x512xf32, #tpu.memory_space<vmem>>, vector<1x512xf32>
    %4 = vector.broadcast %3 : vector<1x512xf32> to vector<8x512xf32>
    %5 = arith.addf %2, %4 : vector<8x512xf32>
    %cst_5 = arith.constant 0.000000e+00 : f32
    %6 = vector.broadcast %cst_5 : f32 to vector<8x512xf32>
    %7 = arith.maximumf %5, %6 : vector<8x512xf32>
    %c0_6 = arith.constant 0 : index
    %c0_7 = arith.constant 0 : index
    %8 = vector.load %arg4[%c0_6, %c0_7] : memref<512x128xf32, #tpu.memory_space<vmem>>, vector<512x128xf32>
    %cst_8 = arith.constant dense<0.000000e+00> : vector<8x128xf32>
    %9 = tpu.matmul %7, %8, %cst_8 {dimension_numbers = #tpu.dot_dimension_numbers<[1], [0], [0], [1], [0, 0, 1, 1], [], []>} : vector<8x512xf32>, vector<512x128xf32>, vector<8x128xf32> -> vector<8x128xf32>
    %c0_9 = arith.constant 0 : index
    %c0_10 = arith.constant 0 : index
    %10 = vector.load %arg5[%c0_9, %c0_10] : memref<1x128xf32, #tpu.memory_space<vmem>>, vector<1x128xf32>
    %11 = vector.broadcast %10 : vector<1x128xf32> to vector<8x128xf32>
    %12 = arith.addf %9, %11 : vector<8x128xf32>
    %c0_11 = arith.constant 0 : index
    %c0_12 = arith.constant 0 : index
    %13 = vector.load %arg6[%c0_11, %c0_12] : memref<8x128xf32, #tpu.memory_space<vmem>>, vector<8x128xf32>
    tpu.vector_store %arg6[%c0_11, %c0_12], %12 {strides = array<i32>} : memref<8x128xf32, #tpu.memory_space<vmem>>, vector<8x128xf32>,
    return
  }
  func.func @transform_0(%arg0: i32) -> (i32, i32) {
    %c0_i32 = arith.constant 0 : i32
    %c0_i32_0 = arith.constant 0 : i32
    return %arg0, %c0_i32 : i32, i32
  }
  func.func @transform_1(%arg0: i32) -> (i32, i32) {
    %c0_i32 = arith.constant 0 : i32
    %c0_i32_0 = arith.constant 0 : i32
    %c0_i32_1 = arith.constant 0 : i32
    return %c0_i32, %c0_i32_0 : i32, i32
  }
  func.func @transform_2(%arg0: i32) -> (i32, i32) {
    %c0_i32 = arith.constant 0 : i32
    %c0_i32_0 = arith.constant 0 : i32
    %c0_i32_1 = arith.constant 0 : i32
    return %c0_i32, %c0_i32_0 : i32, i32
  }
  func.func @transform_3(%arg0: i32) -> (i32, i32) {
    %c0_i32 = arith.constant 0 : i32
    %c0_i32_0 = arith.constant 0 : i32
    %c0_i32_1 = arith.constant 0 : i32
    return %c0_i32, %c0_i32_0 : i32, i32
  }
  func.func @transform_4(%arg0: i32) -> (i32, i32) {
    %c0_i32 = arith.constant 0 : i32
    %c0_i32_0 = arith.constant 0 : i32
    %c0_i32_1 = arith.constant 0 : i32
    return %c0_i32, %c0_i32_0 : i32, i32
  }
  func.func @transform_5(%arg0: i32) -> (i32, i32) {
    %c0_i32 = arith.constant 0 : i32
    %c0_i32_0 = arith.constant 0 : i32
    return %arg0, %c0_i32 : i32, i32
  }
}

</mosaic_0001>

<bundles_post_ra>
// kernel: _encoder_forward.1
= control target key start
LH: loop header
LB: loop body
LE: loop exit
PB: predicated region body
PF: predicated region fallthrough
CT: control target
= control target key end

     0   :  { %10 = vsyncpa [#allocation3], 0  ;;  %s1723_s0 = inlined_call_operand.vmem [shape: f32[2,784], index: 0, kind: input, shape index: {}]   ;;  %s1724_s1 = inlined_call_operand.hbm [shape: f32[784,512], index: 1, kind: input, shape index: {}]   ;;  %s1725_s2 = inlined_call_operand.hbm [shape: f32[1,512], index: 2, kind: input, shape index: {}]   ;;  %s1726_s3 = inlined_call_operand.hbm [shape: f32[512,128], index: 3, kind: input, shape index: {}]   ;;  %s1727_s4 = inlined_call_operand.hbm [shape: f32[1,128], index: 4, kind: input, shape index: {}]   ;;  %s1728_s5 = inlined_call_operand.hbm [shape: f32[2,128], index: 5, kind: output, shape index: {}]  }
   0x1   :  { %11 = vsyncpa [#allocation6], 0 }
   0x2   :  { %12 = vsyncpa [#allocation9], 0 }
   0x3   :  { %13 = vsyncpa [#allocation4], 0  ;;  %s1590_s18 = smov [#allocation5]   ;;  %s1591_s20 = smov [#allocation2]  }
   0x4   :  { %s34_s19 = sshll.u32 %s1590_s18, 4  ;;  %s21_s21 = sshll.u32 %s1591_s20, 4  ;;  %s35_s19 = int_to_ptr.vmem [resolvable:$true] %s34_s19  ;;  %s22_s21 = int_to_ptr.vmem [resolvable:$true] %s21_s21 }
   0x5   :  { %s1490_s22 = scalar_lea.vmem %s35_s19, 64  ;;  %p1495_p1 = scmp.lt.s32.totalorder %s35_s19, %s35_s19 }
   0x6   :  { %p1491_p0 = scmp.ne.s32.totalorder %s35_s19, %s1490_s22  ;;  %p1496_p2 = scmp.lt.s32.totalorder %s1490_s22, %s1490_s22 }
   0x8   :  { %p1497_p3 = por %p1496_p2, %p1495_p1 }
   0xa   :  { %p1498_p4 = pnand %p1497_p3, %p1491_p0 }
   0xc   :  { %1501 = shalt.err (!%p1498_p4)
}
   0xd   :  { %37 = dma.hbm_to_vmem [thread:$0]  %s1725_s2, 64, %s35_s19, [#allocation6]  }
   0xe   :  { %s1510_s25 = scalar_lea.vmem %s22_s21, 50176  ;;  %p1515_p6 = scmp.lt.s32.totalorder %s22_s21, %s22_s21 }
   0xf   :  { %p1511_p5 = scmp.ne.s32.totalorder %s22_s21, %s1510_s25  ;;  %p1516_p7 = scmp.lt.s32.totalorder %s1510_s25, %s1510_s25 }
  0x11   :  { %p1517_p8 = por %p1516_p7, %p1515_p6 }
  0x13   :  { %p1518_p9 = pnand %p1517_p8, %p1511_p5 }
  0x15   :  { %1521 = shalt.err (!%p1518_p9)
}
  0x16   :  { %s1592_s26 = smov 512   ;;  %s1593_s27 = smov 32  }
  0x17   :  { %27 = dma.hbm_to_vmem [thread:$0]  %s1724_s1, 50176, %s22_s21, [#allocation3], %s1592_s26, %s1592_s26, %s1593_s27  }
  0x18   :  { %s1594_s30 = smov [#allocation7]  }
  0x19   :  { %s43_s6 = sshll.u32 %s1594_s30, 4  ;;  %s44_s6 = int_to_ptr.vmem [resolvable:$true] %s43_s6 }
  0x1a   :  { %s1530_s7 = scalar_lea.vmem %s44_s6, 8192  ;;  %p1535_p11 = scmp.lt.s32.totalorder %s44_s6, %s44_s6 }
  0x1b   :  { %p1531_p10 = scmp.ne.s32.totalorder %s44_s6, %s1530_s7  ;;  %p1536_p12 = scmp.lt.s32.totalorder %s1530_s7, %s1530_s7 }
  0x1d   :  { %p1537_p13 = por %p1536_p12, %p1535_p11 }
  0x1f   :  { %p1538_p0 = pnand %p1537_p13, %p1531_p10 }
  0x21   :  { %1541 = shalt.err (!%p1538_p0)
}
  0x22   :  { %s1595_s2 = smov 128   ;;  %s1596_s8 = smov 8  }
  0x23   :  { %49 = dma.hbm_to_vmem [thread:$0]  %s1726_s3, 8192, %s44_s6, [#allocation6], %s1595_s2, %s1595_s2, %s1596_s8  }
  0x24   :  { %s1597_s11 = smov [#allocation8]  }
  0x25   :  { %s56_s12 = sshll.u32 %s1597_s11, 4  ;;  %s57_s12 = int_to_ptr.vmem [resolvable:$true] %s56_s12 }
  0x26   :  { %s1550_s1 = scalar_lea.vmem %s57_s12, 16  ;;  %s1554_s13 = scalar_lea.vmem %s57_s12, 32 }
  0x27   :  { %p1551_p1 = scmp.ne.s32.totalorder %s57_s12, %s1550_s1  ;;  %p1555_p2 = scmp.lt.s32.totalorder %s57_s12, %s57_s12 }
  0x28   :  { %p1556_p3 = scmp.lt.s32.totalorder %s1554_s13, %s1550_s1 }
  0x2a   :  { %p1557_p4 = por %p1556_p3, %p1555_p2 }
  0x2c   :  { %p1558_p5 = pnand %p1557_p4, %p1551_p1 }
  0x2e   :  { %1561 = shalt.err (!%p1558_p5)
}
  0x2f   :  { %59 = dma.hbm_to_vmem [thread:$0]  %s1727_s4, 16, %s57_s12, [#allocation9]  }
  0x30   :  { %1582 = dma.done.wait [#allocation3], 50176  }
  0x31   :  { %1583 = vsyncadd [#allocation3], 4294917120 }
  0x32   :  { %1584 = dma.done.wait [#allocation6], 8256  }
  0x33   :  { %1585 = vsyncadd [#allocation6], 4294959040 }
  0x34   :  { %1586 = dma.done.wait [#allocation9], 16  }
  0x35   :  { %1587 = vsyncadd [#allocation9], 4294967280  ;;  %v141_v0 = vld [vmem:[#allocation2 + $0x1e8] sm:$0xff]  ;;  %v140_v2 = vld [vmem:[#allocation2 + $0x1e0] sm:$0xff]  ;;  %vm579_vm0 = vcmask 130048  }
  0x36   :  { %v269_v1 = vld [vmem:[#allocation2 + $0x5e8] sm:$0xff]  ;;  %582 = vmatprep.subr.mxu0 %v141_v0  ;;  %v268_v3 = vld [vmem:[#allocation2 + $0x5e0] sm:$0xff] }
  0x37   :  { %653 = vmatprep.subr.mxu1 %v269_v1  ;;  %v137_v4 = vld [vmem:[#allocation2 + $0x1c8] sm:$0xff]  ;;  %583 = vmatpush1.msra.mxu0 %v140_v2  ;;  %v136_v6 = vld [vmem:[#allocation2 + $0x1c0] sm:$0xff] }
  0x38   :  { %v265_v5 = vld [vmem:[#allocation2 + $0x5c8] sm:$0xff]  ;;  %654 = vmatpush1.msra.mxu1 %v268_v3  ;;  %v264_v7 = vld [vmem:[#allocation2 + $0x5c0] sm:$0xff]  ;;  %584 = vmatprep.subr.mxu0 %v137_v4 }
  0x39   :  { %v133_v8 = vld [vmem:[#allocation2 + $0x1a8] sm:$0xff]  ;;  %655 = vmatprep.subr.mxu1 %v265_v5  ;;  %v132_v10 = vld [vmem:[#allocation2 + $0x1a0] sm:$0xff]  ;;  %585 = vmatpush1.msra.mxu0 %v136_v6 }
  0x3a   :  { %v261_v9 = vld [vmem:[#allocation2 + $0x5a8] sm:$0xff]  ;;  %v260_v11 = vld [vmem:[#allocation2 + $0x5a0] sm:$0xff]  ;;  %656 = vmatpush1.msra.mxu1 %v264_v7  ;;  %586 = vmatprep.subr.mxu0 %v133_v8 }
  0x3b   :  { %v129_v12 = vld [vmem:[#allocation2 + $0x188] sm:$0xff]  ;;  %657 = vmatprep.subr.mxu1 %v261_v9  ;;  %v128_v14 = vld [vmem:[#allocation2 + $0x180] sm:$0xff]  ;;  %587 = vmatpush1.msra.mxu0 %v132_v10 }
  0x3c   :  { %v257_v13 = vld [vmem:[#allocation2 + $0x588] sm:$0xff]  ;;  %v256_v15 = vld [vmem:[#allocation2 + $0x580] sm:$0xff]  ;;  %658 = vmatpush1.msra.mxu1 %v260_v11  ;;  %588 = vmatprep.subr.mxu0 %v129_v12 }
  0x3d   :  { %v125_v16 = vld [vmem:[#allocation2 + $0x168] sm:$0xff]  ;;  %659 = vmatprep.subr.mxu1 %v257_v13  ;;  %v124_v18 = vld [vmem:[#allocation2 + $0x160] sm:$0xff]  ;;  %589 = vmatpush1.msra.mxu0 %v128_v14 }
  0x3e   :  { %v253_v17 = vld [vmem:[#allocation2 + $0x568] sm:$0xff]  ;;  %v252_v19 = vld [vmem:[#allocation2 + $0x560] sm:$0xff]  ;;  %660 = vmatpush1.msra.mxu1 %v256_v15  ;;  %590 = vmatprep.subr.mxu0 %v125_v16 }
  0x3f   :  { %v121_v20 = vld [vmem:[#allocation2 + $0x148] sm:$0xff]  ;;  %661 = vmatprep.subr.mxu1 %v253_v17  ;;  %v120_v22 = vld [vmem:[#allocation2 + $0x140] sm:$0xff]  ;;  %591 = vmatpush1.msra.mxu0 %v124_v18 }
  0x40   :  { %v249_v21 = vld [vmem:[#allocation2 + $0x548] sm:$0xff]  ;;  %v248_v23 = vld [vmem:[#allocation2 + $0x540] sm:$0xff]  ;;  %662 = vmatpush1.msra.mxu1 %v252_v19  ;;  %592 = vmatprep.subr.mxu0 %v121_v20 }
  0x41   :  { %v117_v24 = vld [vmem:[#allocation2 + $0x128] sm:$0xff]  ;;  %663 = vmatprep.subr.mxu1 %v249_v21  ;;  %v116_v26 = vld [vmem:[#allocation2 + $0x120] sm:$0xff]  ;;  %593 = vmatpush1.msra.mxu0 %v120_v22 }
  0x42   :  { %v245_v25 = vld [vmem:[#allocation2 + $0x528] sm:$0xff]  ;;  %v244_v27 = vld [vmem:[#allocation2 + $0x520] sm:$0xff]  ;;  %664 = vmatpush1.msra.mxu1 %v248_v23  ;;  %594 = vmatprep.subr.mxu0 %v117_v24 }
  0x43   :  { %v113_v28 = vld [vmem:[#allocation2 + $0x108] sm:$0xff]  ;;  %665 = vmatprep.subr.mxu1 %v245_v25  ;;  %v112_v30 = vld [vmem:[#allocation2 + $0x100] sm:$0xff]  ;;  %595 = vmatpush1.msra.mxu0 %v116_v26 }
  0x44   :  { %v241_v29 = vld [vmem:[#allocation2 + $0x508] sm:$0xff]  ;;  %v240_v31 = vld [vmem:[#allocation2 + $0x500] sm:$0xff]  ;;  %666 = vmatpush1.msra.mxu1 %v244_v27  ;;  %596 = vmatprep.subr.mxu0 %v113_v28 }
  0x45   :  { %v109_v32 = vld [vmem:[#allocation2 + $0xe8] sm:$0xff]  ;;  %667 = vmatprep.subr.mxu1 %v241_v29  ;;  %v108_v34 = vld [vmem:[#allocation2 + $0xe0] sm:$0xff]  ;;  %597 = vmatpush1.msra.mxu0 %v112_v30  ;;  %v474_v30 = vlaneseq }
  0x46   :  { %v237_v33 = vld [vmem:[#allocation2 + $0x4e8] sm:$0xff]  ;;  %v236_v35 = vld [vmem:[#allocation2 + $0x4e0] sm:$0xff]  ;;  %668 = vmatpush1.msra.mxu1 %v240_v31  ;;  %598 = vmatprep.subr.mxu0 %v109_v32  ;;  %v1598_v31 = vmov 1983009808  }
  0x47   :  { %v105_v36 = vld [vmem:[#allocation2 + $0xc8] sm:$0xff]  ;;  %669 = vmatprep.subr.mxu1 %v237_v33  ;;  %v104_v38 = vld [vmem:[#allocation2 + $0xc0] sm:$0xff]  ;;  %599 = vmatpush1.msra.mxu0 %v108_v34  ;;  %v507_v32 = vunpack.c.l.s4 %v1598_v31 }
  0x48   :  { %v233_v37 = vld [vmem:[#allocation2 + $0x4c8] sm:$0xff]  ;;  %v232_v39 = vld [vmem:[#allocation2 + $0x4c0] sm:$0xff]  ;;  %670 = vmatpush1.msra.mxu1 %v236_v35  ;;  %600 = vmatprep.subr.mxu0 %v105_v36 }
  0x49   :  { %v101_v40 = vld [vmem:[#allocation2 + $0xa8] sm:$0xff]  ;;  %671 = vmatprep.subr.mxu1 %v233_v37  ;;  %v100_v42 = vld [vmem:[#allocation2 + $0xa0] sm:$0xff]  ;;  %601 = vmatpush1.msra.mxu0 %v104_v38 }
  0x4a   :  { %v229_v41 = vld [vmem:[#allocation2 + $0x4a8] sm:$0xff]  ;;  %v228_v43 = vld [vmem:[#allocation2 + $0x4a0] sm:$0xff]  ;;  %672 = vmatpush1.msra.mxu1 %v232_v39  ;;  %602 = vmatprep.subr.mxu0 %v101_v40 }
  0x4b   :  { %v97_v44 = vld [vmem:[#allocation2 + $0x88] sm:$0xff]  ;;  %673 = vmatprep.subr.mxu1 %v229_v41  ;;  %v96_v46 = vld [vmem:[#allocation2 + $0x80] sm:$0xff]  ;;  %603 = vmatpush1.msra.mxu0 %v100_v42  ;;  %v1645_v42 = vshrl.u32 %v474_v30, 7 }
  0x4c   :  { %v225_v45 = vld [vmem:[#allocation2 + $0x488] sm:$0xff]  ;;  %v224_v47 = vld [vmem:[#allocation2 + $0x480] sm:$0xff]  ;;  %674 = vmatpush1.msra.mxu1 %v228_v43  ;;  %604 = vmatprep.subr.mxu0 %v97_v44  ;;  %v508_v43 = vunpack.c.0.s8 %v507_v32  ;;  %v143_v32 = vld [vmem:[#allocation2 + $0x1f8] sm:$0xff] }
  0x4d   :  { %v93_v48 = vld [vmem:[#allocation2 + $0x68] sm:$0xff]  ;;  %675 = vmatprep.subr.mxu1 %v225_v45  ;;  %v92_v50 = vld [vmem:[#allocation2 + $0x60] sm:$0xff]  ;;  %605 = vmatpush1.msra.mxu0 %v96_v46 }
  0x4e   :  { %v221_v49 = vld [vmem:[#allocation2 + $0x468] sm:$0xff]  ;;  %v220_v51 = vld [vmem:[#allocation2 + $0x460] sm:$0xff]  ;;  %676 = vmatpush1.msra.mxu1 %v224_v47  ;;  %606 = vmatprep.subr.mxu0 %v93_v48 }
  0x4f   :  { %v89_v52 = vld [vmem:[#allocation2 + $0x48] sm:$0xff]  ;;  %677 = vmatprep.subr.mxu1 %v221_v49  ;;  %v88_v54 = vld [vmem:[#allocation2 + $0x40] sm:$0xff]  ;;  %607 = vmatpush1.msra.mxu0 %v92_v50 }
  0x50   :  { %v217_v53 = vld [vmem:[#allocation2 + $0x448] sm:$0xff]  ;;  %v216_v55 = vld [vmem:[#allocation2 + $0x440] sm:$0xff]  ;;  %678 = vmatpush1.msra.mxu1 %v220_v51  ;;  %608 = vmatprep.subr.mxu0 %v89_v52 }
  0x51   :  { %v85_v56 = vld [vmem:[#allocation2 + $0x28] sm:$0xff]  ;;  %679 = vmatprep.subr.mxu1 %v217_v53  ;;  %v84_v58 = vld [vmem:[#allocation2 + $0x20] sm:$0xff]  ;;  %609 = vmatpush1.msra.mxu0 %v88_v54  ;;  %v1654_v54 = vsub.s32 %v508_v43, %v1645_v42 }
  0x52   :  { %v213_v57 = vld [vmem:[#allocation2 + $0x428] sm:$0xff]  ;;  %v212_v59 = vld [vmem:[#allocation2 + $0x420] sm:$0xff]  ;;  %680 = vmatpush1.msra.mxu1 %v216_v55  ;;  %610 = vmatprep.subr.mxu0 %v85_v56 }
  0x53   :  { %v81_v60 = vld [vmem:[#allocation2 + $0x8] sm:$0xff]  ;;  %681 = vmatprep.subr.mxu1 %v213_v57  ;;  %v80_v62 = vld [vmem:[#allocation2] sm:$0xff]  ;;  %611 = vmatpush1.msra.mxu0 %v84_v58 }
  0x54   :  { %v209_v61 = vld [vmem:[#allocation2 + $0x408] sm:$0xff]  ;;  %v208_v63 = vld [vmem:[#allocation2 + $0x400] sm:$0xff]  ;;  %682 = vmatpush1.msra.mxu1 %v212_v59  ;;  %612 = vmatprep.subr.mxu0 %v81_v60 }
  0x55   :  { %v205_v0 = vld [vmem:[#allocation2 + $0x3e8] sm:$0xff]  ;;  %683 = vmatprep.subr.mxu1 %v209_v61  ;;  %v204_v2 = vld [vmem:[#allocation2 + $0x3e0] sm:$0xff]  ;;  %613 = vmatpush1.msra.mxu0 %v80_v62 }
  0x56   :  { %v333_v1 = vld [vmem:[#allocation2 + $0x7e8] sm:$0xff]  ;;  %v332_v3 = vld [vmem:[#allocation2 + $0x7e0] sm:$0xff]  ;;  %684 = vmatpush1.msra.mxu1 %v208_v63  ;;  %614 = vmatprep.subr.mxu0 %v205_v0 }
  0x57   :  { %v201_v4 = vld [vmem:[#allocation2 + $0x3c8] sm:$0xff]  ;;  %685 = vmatprep.subr.mxu1 %v333_v1  ;;  %v200_v6 = vld [vmem:[#allocation2 + $0x3c0] sm:$0xff]  ;;  %615 = vmatpush2.msra.mxu0 %v204_v2 }
  0x58   :  { %v329_v5 = vld [vmem:[#allocation2 + $0x7c8] sm:$0xff]  ;;  %v328_v7 = vld [vmem:[#allocation2 + $0x7c0] sm:$0xff]  ;;  %686 = vmatpush2.msra.mxu1 %v332_v3  ;;  %616 = vmatprep.subr.mxu0 %v201_v4 }
  0x59   :  { %v197_v8 = vld [vmem:[#allocation2 + $0x3a8] sm:$0xff]  ;;  %687 = vmatprep.subr.mxu1 %v329_v5  ;;  %v196_v10 = vld [vmem:[#allocation2 + $0x3a0] sm:$0xff]  ;;  %617 = vmatpush2.msra.mxu0 %v200_v6 }
  0x5a   :  { %v325_v9 = vld [vmem:[#allocation2 + $0x7a8] sm:$0xff]  ;;  %v324_v11 = vld [vmem:[#allocation2 + $0x7a0] sm:$0xff]  ;;  %688 = vmatpush2.msra.mxu1 %v328_v7  ;;  %618 = vmatprep.subr.mxu0 %v197_v8 }
  0x5b   :  { %v193_v12 = vld [vmem:[#allocation2 + $0x388] sm:$0xff]  ;;  %689 = vmatprep.subr.mxu1 %v325_v9  ;;  %v192_v14 = vld [vmem:[#allocation2 + $0x380] sm:$0xff]  ;;  %619 = vmatpush2.msra.mxu0 %v196_v10 }
  0x5c   :  { %v321_v13 = vld [vmem:[#allocation2 + $0x788] sm:$0xff]  ;;  %v320_v15 = vld [vmem:[#allocation2 + $0x780] sm:$0xff]  ;;  %690 = vmatpush2.msra.mxu1 %v324_v11  ;;  %620 = vmatprep.subr.mxu0 %v193_v12 }
  0x5d   :  { %v189_v16 = vld [vmem:[#allocation2 + $0x368] sm:$0xff]  ;;  %691 = vmatprep.subr.mxu1 %v321_v13  ;;  %v188_v18 = vld [vmem:[#allocation2 + $0x360] sm:$0xff]  ;;  %621 = vmatpush2.msra.mxu0 %v192_v14 }
  0x5e   :  { %v317_v17 = vld [vmem:[#allocation2 + $0x768] sm:$0xff]  ;;  %v316_v19 = vld [vmem:[#allocation2 + $0x760] sm:$0xff]  ;;  %692 = vmatpush2.msra.mxu1 %v320_v15  ;;  %622 = vmatprep.subr.mxu0 %v189_v16 }
  0x5f   :  { %v185_v20 = vld [vmem:[#allocation2 + $0x348] sm:$0xff]  ;;  %v184_v22 = vld [vmem:[#allocation2 + $0x340] sm:$0xff]  ;;  %693 = vmatprep.subr.mxu1 %v317_v17  ;;  %623 = vmatpush2.msra.mxu0 %v188_v18 }
  0x60   :  { %v313_v21 = vld [vmem:[#allocation2 + $0x748] sm:$0xff]  ;;  %v312_v23 = vld [vmem:[#allocation2 + $0x740] sm:$0xff]  ;;  %694 = vmatpush2.msra.mxu1 %v316_v19  ;;  %624 = vmatprep.subr.mxu0 %v185_v20 }
  0x61   :  { %v181_v24 = vld [vmem:[#allocation2 + $0x328] sm:$0xff]  ;;  %v180_v26 = vld [vmem:[#allocation2 + $0x320] sm:$0xff]  ;;  %695 = vmatprep.subr.mxu1 %v313_v21  ;;  %625 = vmatpush2.msra.mxu0 %v184_v22 }
  0x62   :  { %v309_v25 = vld [vmem:[#allocation2 + $0x728] sm:$0xff]  ;;  %v308_v27 = vld [vmem:[#allocation2 + $0x720] sm:$0xff]  ;;  %696 = vmatpush2.msra.mxu1 %v312_v23  ;;  %626 = vmatprep.subr.mxu0 %v181_v24 }
  0x63   :  { %v177_v28 = vld [vmem:[#allocation2 + $0x308] sm:$0xff]  ;;  %697 = vmatprep.subr.mxu1 %v309_v25  ;;  %v176_v33 = vld [vmem:[#allocation2 + $0x300] sm:$0xff]  ;;  %627 = vmatpush2.msra.mxu0 %v180_v26 }
  0x64   :  { %v305_v29 = vld [vmem:[#allocation2 + $0x708] sm:$0xff]  ;;  %v304_v34 = vld [vmem:[#allocation2 + $0x700] sm:$0xff]  ;;  %698 = vmatpush2.msra.mxu1 %v308_v27  ;;  %628 = vmatprep.subr.mxu0 %v177_v28 }
  0x65   :  { %v173_v35 = vld [vmem:[#allocation2 + $0x2e8] sm:$0xff]  ;;  %v172_v37 = vld [vmem:[#allocation2 + $0x2e0] sm:$0xff]  ;;  %699 = vmatprep.subr.mxu1 %v305_v29  ;;  %629 = vmatpush2.msra.mxu0 %v176_v33 }
  0x66   :  { %v301_v36 = vld [vmem:[#allocation2 + $0x6e8] sm:$0xff]  ;;  %v300_v38 = vld [vmem:[#allocation2 + $0x6e0] sm:$0xff]  ;;  %700 = vmatpush2.msra.mxu1 %v304_v34  ;;  %630 = vmatprep.subr.mxu0 %v173_v35  ;;  %v142_v34 = vld [vmem:[#allocation2 + $0x1f0] sm:$0xff]  ;;  %v1599_v35 = vmov 0.0  }
  0x67   :  { %v169_v39 = vld [vmem:[#allocation2 + $0x2c8] sm:$0xff]  ;;  %v168_v41 = vld [vmem:[#allocation2 + $0x2c0] sm:$0xff]  ;;  %701 = vmatprep.subr.mxu1 %v301_v36  ;;  %631 = vmatpush2.msra.mxu0 %v172_v37  ;;  %v139_v37 = vld [vmem:[#allocation2 + $0x1d8] sm:$0xff] }
  0x68   :  { %v297_v40 = vld [vmem:[#allocation2 + $0x6c8] sm:$0xff]  ;;  %v296_v44 = vld [vmem:[#allocation2 + $0x6c0] sm:$0xff]  ;;  %702 = vmatpush2.msra.mxu1 %v300_v38  ;;  %632 = vmatprep.subr.mxu0 %v169_v39  ;;  %v138_v39 = vld [vmem:[#allocation2 + $0x1d0] sm:$0xff] }
  0x69   :  { %v165_v45 = vld [vmem:[#allocation2 + $0x2a8] sm:$0xff]  ;;  %v164_v47 = vld [vmem:[#allocation2 + $0x2a0] sm:$0xff]  ;;  %703 = vmatprep.subr.mxu1 %v297_v40  ;;  %633 = vmatpush2.msra.mxu0 %v168_v41  ;;  %v135_v41 = vld [vmem:[#allocation2 + $0x1b8] sm:$0xff] }
  0x6a   :  { %v293_v46 = vld [vmem:[#allocation2 + $0x6a8] sm:$0xff]  ;;  %v292_v48 = vld [vmem:[#allocation2 + $0x6a0] sm:$0xff]  ;;  %704 = vmatpush2.msra.mxu1 %v296_v44  ;;  %634 = vmatprep.subr.mxu0 %v165_v45  ;;  %v134_v44 = vld [vmem:[#allocation2 + $0x1b0] sm:$0xff] }
  0x6b   :  { %v161_v49 = vld [vmem:[#allocation2 + $0x288] sm:$0xff]  ;;  %v160_v51 = vld [vmem:[#allocation2 + $0x280] sm:$0xff]  ;;  %705 = vmatprep.subr.mxu1 %v293_v46  ;;  %635 = vmatpush2.msra.mxu0 %v164_v47  ;;  %v131_v46 = vld [vmem:[#allocation2 + $0x198] sm:$0xff] }
  0x6c   :  { %v289_v50 = vld [vmem:[#allocation2 + $0x688] sm:$0xff]  ;;  %v288_v55 = vld [vmem:[#allocation2 + $0x680] sm:$0xff]  ;;  %706 = vmatpush2.msra.mxu1 %v292_v48  ;;  %636 = vmatprep.subr.mxu0 %v161_v49  ;;  %v130_v48 = vld [vmem:[#allocation2 + $0x190] sm:$0xff] }
  0x6d   :  { %v1470_v52 = vld [vmem:[%s1723_s0] ss:$14 sps:$4 sm:$0xff]   ;;  %v1472_v53 = vld [vmem:[%s1723_s0 + $0x1c] ss:$14 sps:$4 sm:$0xff]   ;;  %v1474_v56 = vld [vmem:[%s1723_s0 + $0x4] ss:$14 sps:$4 sm:$0xff]   ;;  %707 = vmatprep.subr.mxu1 %v289_v50  ;;  %637 = vmatpush2.msra.mxu0 %v160_v51 }
  0x6e   :  { %v1475_v57 = vld [vmem:[%s1723_s0 + $0x20] ss:$14 sps:$4 sm:$0xff]   ;;  %708 = vmatpush2.msra.mxu1 %v288_v55  ;;  %v512_v0 = vrot.slane %v1470_v52, %v1654_v54  ;;  %v526_v1 = vrot.slane %v1472_v53, %v1654_v54  ;;  %v519_v4 = vrot.slane %v1474_v56, %v1654_v54  ;;  %v1476_v13 = vld [vmem:[%s1723_s0 + $0xc] ss:$14 sps:$4 sm:$0x33]  }
  0x6f   :  { %v157_v58 = vld [vmem:[#allocation2 + $0x268] sm:$0xff]  ;;  %v156_v60 = vld [vmem:[#allocation2 + $0x260] sm:$0xff]  ;;  %v533_v5 = vrot.slane %v1475_v57, %v1654_v54  ;;  %v555_v22 = vrot.slane %v1476_v13, %v1654_v54  ;;  %v127_v50 = vld [vmem:[#allocation2 + $0x178] sm:$0xff] }
  0x70   :  { %v285_v59 = vld [vmem:[#allocation2 + $0x668] sm:$0xff]  ;;  %v284_v61 = vld [vmem:[#allocation2 + $0x660] sm:$0xff]  ;;  %638 = vmatprep.subr.mxu0 %v157_v58  ;;  %v1666_v12 = vcombine.high %v512_v0, %v526_v1  ;;  %v1676_v18 = vcombine.low %v512_v0, %v526_v1  ;;  %v126_v52 = vld [vmem:[#allocation2 + $0x170] sm:$0xff] }
  0x71   :  { %v153_v62 = vld [vmem:[#allocation2 + $0x248] sm:$0xff]  ;;  %709 = vmatprep.subr.mxu1 %v285_v59  ;;  %v152_v2 = vld [vmem:[#allocation2 + $0x240] sm:$0xff]  ;;  %639 = vmatpush2.msra.mxu0 %v156_v60  ;;  %v1674_v16 = vcombine.high %v519_v4, %v533_v5  ;;  %v1678_v19 = vcombine.low %v519_v4, %v533_v5  ;;  %v123_v55 = vld [vmem:[#allocation2 + $0x158] sm:$0xff] }
  0x72   :  { %v281_v63 = vld [vmem:[#allocation2 + $0x648] sm:$0xff]  ;;  %v280_v3 = vld [vmem:[#allocation2 + $0x640] sm:$0xff]  ;;  %710 = vmatpush2.msra.mxu1 %v284_v61  ;;  %640 = vmatprep.subr.mxu0 %v153_v62  ;;  %v122_v57 = vld [vmem:[#allocation2 + $0x150] sm:$0xff] }
  0x73   :  { %v149_v6 = vld [vmem:[#allocation2 + $0x228] sm:$0xff]  ;;  %v148_v8 = vld [vmem:[#allocation2 + $0x220] sm:$0xff]  ;;  %711 = vmatprep.subr.mxu1 %v281_v63  ;;  %641 = vmatpush2.msra.mxu0 %v152_v2  ;;  %v119_v59 = vld [vmem:[#allocation2 + $0x138] sm:$0xff] }
  0x74   :  { %v277_v7 = vld [vmem:[#allocation2 + $0x628] sm:$0xff]  ;;  %v276_v9 = vld [vmem:[#allocation2 + $0x620] sm:$0xff]  ;;  %712 = vmatpush2.msra.mxu1 %v280_v3  ;;  %642 = vmatprep.subr.mxu0 %v149_v6  ;;  %v118_v61 = vld [vmem:[#allocation2 + $0x130] sm:$0xff] }
  0x75   :  { %v145_v10 = vld [vmem:[#allocation2 + $0x208] sm:$0xff]  ;;  %713 = vmatprep.subr.mxu1 %v277_v7  ;;  %v144_v15 = vld [vmem:[#allocation2 + $0x200] sm:$0xff]  ;;  %643 = vmatpush2.msra.mxu0 %v148_v8  ;;  %v115_v63 = vld [vmem:[#allocation2 + $0x118] sm:$0xff] }
  0x76   :  { %v273_v11 = vld [vmem:[#allocation2 + $0x608] sm:$0xff]  ;;  %714 = vmatpush2.msra.mxu1 %v276_v9  ;;  %v272_v17 = vld [vmem:[#allocation2 + $0x600] sm:$0xff]  ;;  %644 = vmatprep.subr.mxu0 %v145_v10  ;;  %v114_v1 = vld [vmem:[#allocation2 + $0x110] sm:$0xff] }
  0x77   :  { %v1478_v14 = vld [vmem:[%s1723_s0 + $0x28] ss:$14 sps:$4 sm:$0x33]   ;;  %715 = vmatprep.subr.mxu1 %v273_v11  ;;  %645 = vmatpush2.msra.mxu0 %v144_v15  ;;  %v396_v24 = vld [vmem:[#allocation2 + $0x9e0] sm:$0xff]  ;;  %v111_v3 = vld [vmem:[#allocation2 + $0xf8] sm:$0xff] }
  0x78   :  { %646 = vmatprep.mubr.f32.mxu0 %v1666_v12  ;;  %v397_v20 = vld [vmem:[#allocation2 + $0x9e8] sm:$0xff]  ;;  %v569_v23 = vrot.slane %v1478_v14, %v1654_v54  ;;  %716 = vmatpush2.msra.mxu1 %v272_v17  ;;  %v468_v25 = vld [vmem:[#allocation2 + $0xc20] sm:$0xff]  ;;  %v110_v5 = vld [vmem:[#allocation2 + $0xf0] sm:$0xff] }
  0x79   :  { %v469_v21 = vld [vmem:[#allocation2 + $0xc28] sm:$0xff]  ;;  %717 = vmatprep.mubr.f32.mxu1 %v1674_v16  ;;  %647 = vmatmul.mubr.f32.vlgmr.msra.gmra.mxu0 %v1676_v18  ;;  %v392_v28 = vld [vmem:[#allocation2 + $0x9c0] sm:$0xff]  ;;  %v107_v7 = vld [vmem:[#allocation2 + $0xd8] sm:$0xff] }
  0x7a   :  { %718 = vmatmul.mubr.f32.vlgmr.msra.gmra.mxu1 %v1678_v19  ;;  %v393_v26 = vld [vmem:[#allocation2 + $0x9c8] sm:$0xff]  ;;  %724 = vmatprep.subr.mxu0 %v397_v20  ;;  %v464_v29 = vld [vmem:[#allocation2 + $0xc00] sm:$0xff]  ;;  %v1686_v31 = vcombine.low %v555_v22, %v569_v23  ;;  %v106_v9 = vld [vmem:[#allocation2 + $0xd0] sm:$0xff] }
  0x7b   :  { %v465_v27 = vld [vmem:[#allocation2 + $0xc08] sm:$0xff]  ;;  %823 = vmatprep.subr.mxu1 %v469_v21  ;;  %725 = vmatpush1.msra.mxu0 %v396_v24  ;;  %v388_v33 = vld [vmem:[#allocation2 + $0x9a0] sm:$0xff]  ;;  %v103_v11 = vld [vmem:[#allocation2 + $0xb8] sm:$0xff] }
  0x7c   :  { %824 = vmatpush1.msra.mxu1 %v468_v25  ;;  %v389_v30 = vld [vmem:[#allocation2 + $0x9a8] sm:$0xff]  ;;  %726 = vmatprep.subr.mxu0 %v393_v26  ;;  %v384_v38 = vld [vmem:[#allocation2 + $0x980] sm:$0xff]  ;;  %v102_v14 = vld [vmem:[#allocation2 + $0xb0] sm:$0xff] }
  0x7d   :  { %825 = vmatprep.subr.mxu1 %v465_v27  ;;  %727 = vmatpush1.msra.mxu0 %v392_v28  ;;  %v385_v36 = vld [vmem:[#allocation2 + $0x988] sm:$0xff]  ;;  %v380_v43 = vld [vmem:[#allocation2 + $0x960] sm:$0xff]  ;;  %v99_v17 = vld [vmem:[#allocation2 + $0x98] sm:$0xff] }
  0x7e   :  { %826 = vmatpush1.msra.mxu1 %v464_v29  ;;  %859 = vmatprep.mubr.f32.mxu1 %v1599_v35  ;;  %v381_v40 = vld [vmem:[#allocation2 + $0x968] sm:$0xff]  ;;  %v376_v47 = vld [vmem:[#allocation2 + $0x940] sm:$0xff]  ;;  %v98_v21 = vld [vmem:[#allocation2 + $0x90] sm:$0xff] }
  0x7f   :  { %728 = vmatprep.subr.mxu0 %v389_v30  ;;  %1385 = vmatmul.mubr.msk.f32.vlgmr.msra.gmra.mxu1 %vm579_vm0, %v1686_v31  ;;  %v377_v45 = vld [vmem:[#allocation2 + $0x948] sm:$0xff]  ;;  %v372_v51 = vld [vmem:[#allocation2 + $0x920] sm:$0xff]  ;;  %v95_v23 = vld [vmem:[#allocation2 + $0x78] sm:$0xff] }
  0x80   :  { %866 = vmatprep.subr.mxu1 %v143_v32  ;;  %729 = vmatpush1.msra.mxu0 %v388_v33  ;;  %v373_v49 = vld [vmem:[#allocation2 + $0x928] sm:$0xff]  ;;  %v368_v56 = vld [vmem:[#allocation2 + $0x900] sm:$0xff]  ;;  %v94_v25 = vld [vmem:[#allocation2 + $0x70] sm:$0xff] }
  0x81   :  { %867 = vmatpush1.msra.mxu1 %v142_v34  ;;  %730 = vmatprep.subr.mxu0 %v385_v36  ;;  %v369_v53 = vld [vmem:[#allocation2 + $0x908] sm:$0xff]  ;;  %v364_v60 = vld [vmem:[#allocation2 + $0x8e0] sm:$0xff]  ;;  %v91_v27 = vld [vmem:[#allocation2 + $0x58] sm:$0xff] }
  0x82   :  { %868 = vmatprep.subr.mxu1 %v139_v37  ;;  %731 = vmatpush1.msra.mxu0 %v384_v38  ;;  %v365_v58 = vld [vmem:[#allocation2 + $0x8e8] sm:$0xff]  ;;  %v360_v0 = vld [vmem:[#allocation2 + $0x8c0] sm:$0xff]  ;;  %v90_v29 = vld [vmem:[#allocation2 + $0x50] sm:$0xff] }
  0x83   :  { %869 = vmatpush1.msra.mxu1 %v138_v39  ;;  %732 = vmatprep.subr.mxu0 %v381_v40  ;;  %v361_v62 = vld [vmem:[#allocation2 + $0x8c8] sm:$0xff]  ;;  %v356_v4 = vld [vmem:[#allocation2 + $0x8a0] sm:$0xff]  ;;  %v87_v32 = vld [vmem:[#allocation2 + $0x38] sm:$0xff] }
  0x84   :  { %870 = vmatprep.subr.mxu1 %v135_v41  ;;  %733 = vmatpush1.msra.mxu0 %v380_v43  ;;  %v357_v2 = vld [vmem:[#allocation2 + $0x8a8] sm:$0xff]  ;;  %v352_v8 = vld [vmem:[#allocation2 + $0x880] sm:$0xff]  ;;  %v86_v34 = vld [vmem:[#allocation2 + $0x30] sm:$0xff] }
  0x85   :  { %871 = vmatpush1.msra.mxu1 %v134_v44  ;;  %734 = vmatprep.subr.mxu0 %v377_v45  ;;  %v353_v6 = vld [vmem:[#allocation2 + $0x888] sm:$0xff]  ;;  %v348_v13 = vld [vmem:[#allocation2 + $0x860] sm:$0xff]  ;;  %v83_v37 = vld [vmem:[#allocation2 + $0x18] sm:$0xff] }
  0x86   :  { %872 = vmatprep.subr.mxu1 %v131_v46  ;;  %735 = vmatpush1.msra.mxu0 %v376_v47  ;;  %v349_v10 = vld [vmem:[#allocation2 + $0x868] sm:$0xff]  ;;  %v344_v20 = vld [vmem:[#allocation2 + $0x840] sm:$0xff]  ;;  %v82_v39 = vld [vmem:[#allocation2 + $0x10] sm:$0xff] }
  0x87   :  { %873 = vmatpush1.msra.mxu1 %v130_v48  ;;  %736 = vmatprep.subr.mxu0 %v373_v49  ;;  %v345_v15 = vld [vmem:[#allocation2 + $0x848] sm:$0xff]  ;;  %v340_v24 = vld [vmem:[#allocation2 + $0x820] sm:$0xff]  ;;  %v207_v41 = vld [vmem:[#allocation2 + $0x3f8] sm:$0xff] }
  0x88   :  { %874 = vmatprep.subr.mxu1 %v127_v50  ;;  %737 = vmatpush1.msra.mxu0 %v372_v51  ;;  %v341_v22 = vld [vmem:[#allocation2 + $0x828] sm:$0xff]  ;;  %v336_v28 = vld [vmem:[#allocation2 + $0x800] sm:$0xff]  ;;  %v206_v44 = vld [vmem:[#allocation2 + $0x3f0] sm:$0xff] }
  0x89   :  { %875 = vmatpush1.msra.mxu1 %v126_v52  ;;  %738 = vmatprep.subr.mxu0 %v369_v53  ;;  %v337_v26 = vld [vmem:[#allocation2 + $0x808] sm:$0xff]  ;;  %v460_v33 = vld [vmem:[#allocation2 + $0xbe0] sm:$0xff]  ;;  %v203_v46 = vld [vmem:[#allocation2 + $0x3d8] sm:$0xff] }
  0x8a   :  { %876 = vmatprep.subr.mxu1 %v123_v55  ;;  %739 = vmatpush1.msra.mxu0 %v368_v56  ;;  %v461_v30 = vld [vmem:[#allocation2 + $0xbe8] sm:$0xff]  ;;  %v456_v38 = vld [vmem:[#allocation2 + $0xbc0] sm:$0xff]  ;;  %v202_v48 = vld [vmem:[#allocation2 + $0x3d0] sm:$0xff] }
  0x8b   :  { %877 = vmatpush1.msra.mxu1 %v122_v57  ;;  %740 = vmatprep.subr.mxu0 %v365_v58  ;;  %v457_v36 = vld [vmem:[#allocation2 + $0xbc8] sm:$0xff]  ;;  %v452_v43 = vld [vmem:[#allocation2 + $0xba0] sm:$0xff]  ;;  %v199_v50 = vld [vmem:[#allocation2 + $0x3b8] sm:$0xff] }
  0x8c   :  { %878 = vmatprep.subr.mxu1 %v119_v59  ;;  %741 = vmatpush1.msra.mxu0 %v364_v60  ;;  %v453_v40 = vld [vmem:[#allocation2 + $0xba8] sm:$0xff]  ;;  %v448_v47 = vld [vmem:[#allocation2 + $0xb80] sm:$0xff]  ;;  %v198_v52 = vld [vmem:[#allocation2 + $0x3b0] sm:$0xff] }
  0x8d   :  { %879 = vmatpush1.msra.mxu1 %v118_v61  ;;  %742 = vmatprep.subr.mxu0 %v361_v62  ;;  %v449_v45 = vld [vmem:[#allocation2 + $0xb88] sm:$0xff]  ;;  %v444_v51 = vld [vmem:[#allocation2 + $0xb60] sm:$0xff]  ;;  %v195_v55 = vld [vmem:[#allocation2 + $0x398] sm:$0xff] }
  0x8e   :  { %880 = vmatprep.subr.mxu1 %v115_v63  ;;  %743 = vmatpush1.msra.mxu0 %v360_v0  ;;  %v445_v49 = vld [vmem:[#allocation2 + $0xb68] sm:$0xff]  ;;  %v440_v56 = vld [vmem:[#allocation2 + $0xb40] sm:$0xff]  ;;  %v194_v57 = vld [vmem:[#allocation2 + $0x390] sm:$0xff] }
  0x8f   :  { %881 = vmatpush1.msra.mxu1 %v114_v1  ;;  %744 = vmatprep.subr.mxu0 %v357_v2  ;;  %v441_v53 = vld [vmem:[#allocation2 + $0xb48] sm:$0xff]  ;;  %v191_v59 = vld [vmem:[#allocation2 + $0x378] sm:$0xff]  ;;  %v436_v60 = vld [vmem:[#allocation2 + $0xb20] sm:$0xff] }
  0x90   :  { %882 = vmatprep.subr.mxu1 %v111_v3  ;;  %745 = vmatpush1.msra.mxu0 %v356_v4  ;;  %v437_v58 = vld [vmem:[#allocation2 + $0xb28] sm:$0xff]  ;;  %v190_v61 = vld [vmem:[#allocation2 + $0x370] sm:$0xff]  ;;  %v187_v63 = vld [vmem:[#allocation2 + $0x358] sm:$0xff] }
  0x91   :  { %883 = vmatpush1.msra.mxu1 %v110_v5  ;;  %746 = vmatprep.subr.mxu0 %v353_v6  ;;  %v433_v62 = vld [vmem:[#allocation2 + $0xb08] sm:$0xff]  ;;  %v432_v0 = vld [vmem:[#allocation2 + $0xb00] sm:$0xff]  ;;  %v186_v1 = vld [vmem:[#allocation2 + $0x350] sm:$0xff] }
  0x92   :  { %884 = vmatprep.subr.mxu1 %v107_v7  ;;  %747 = vmatpush1.msra.mxu0 %v352_v8  ;;  %v429_v2 = vld [vmem:[#allocation2 + $0xae8] sm:$0xff]  ;;  %v183_v3 = vld [vmem:[#allocation2 + $0x338] sm:$0xff]  ;;  %v428_v4 = vld [vmem:[#allocation2 + $0xae0] sm:$0xff] }
  0x93   :  { %885 = vmatpush1.msra.mxu1 %v106_v9  ;;  %748 = vmatprep.subr.mxu0 %v349_v10  ;;  %v182_v5 = vld [vmem:[#allocation2 + $0x330] sm:$0xff]  ;;  %v425_v6 = vld [vmem:[#allocation2 + $0xac8] sm:$0xff]  ;;  %v179_v7 = vld [vmem:[#allocation2 + $0x318] sm:$0xff] }
  0x94   :  { %886 = vmatprep.subr.mxu1 %v103_v11  ;;  %749 = vmatpush1.msra.mxu0 %v348_v13  ;;  %v424_v8 = vld [vmem:[#allocation2 + $0xac0] sm:$0xff]  ;;  %v178_v9 = vld [vmem:[#allocation2 + $0x310] sm:$0xff]  ;;  %v421_v10 = vld [vmem:[#allocation2 + $0xaa8] sm:$0xff] }
  0x95   :  { %887 = vmatpush1.msra.mxu1 %v102_v14  ;;  %750 = vmatprep.subr.mxu0 %v345_v15  ;;  %v175_v11 = vld [vmem:[#allocation2 + $0x2f8] sm:$0xff]  ;;  %v420_v13 = vld [vmem:[#allocation2 + $0xaa0] sm:$0xff]  ;;  %v174_v14 = vld [vmem:[#allocation2 + $0x2f0] sm:$0xff] }
  0x96   :  { %888 = vmatprep.subr.mxu1 %v99_v17  ;;  %751 = vmatpush1.msra.mxu0 %v344_v20  ;;  %v417_v15 = vld [vmem:[#allocation2 + $0xa88] sm:$0xff]  ;;  %v171_v17 = vld [vmem:[#allocation2 + $0x2d8] sm:$0xff] }
  0x97   :  { %889 = vmatpush1.msra.mxu1 %v98_v21  ;;  %752 = vmatprep.subr.mxu0 %v341_v22  ;;  %v1480_v20 = vld [vmem:[%s1723_s0 + $0x8] ss:$14 sps:$4 sm:$0xff]   ;;  %v1481_v21 = vld [vmem:[%s1723_s0 + $0x24] ss:$14 sps:$4 sm:$0xff]  }
  0x98   :  { %890 = vmatprep.subr.mxu1 %v95_v23  ;;  %753 = vmatpush1.msra.mxu0 %v340_v24  ;;  %v416_v22 = vld [vmem:[#allocation2 + $0xa80] sm:$0xff]  ;;  %v170_v23 = vld [vmem:[#allocation2 + $0x2d0] sm:$0xff]  ;;  %v413_v24 = vld [vmem:[#allocation2 + $0xa68] sm:$0xff] }
  0x99   :  { %891 = vmatpush1.msra.mxu1 %v94_v25  ;;  %754 = vmatprep.subr.mxu0 %v337_v26  ;;  %v167_v25 = vld [vmem:[#allocation2 + $0x2b8] sm:$0xff]  ;;  %v412_v26 = vld [vmem:[#allocation2 + $0xa60] sm:$0xff] }
  0x9a   :  { %892 = vmatprep.subr.mxu1 %v91_v27  ;;  %755 = vmatpush1.msra.mxu0 %v336_v28  ;;  %v166_v27 = vld [vmem:[#allocation2 + $0x2b0] sm:$0xff]  ;;  %v409_v28 = vld [vmem:[#allocation2 + $0xa48] sm:$0xff] }
  0x9b   :  { %893 = vmatpush1.msra.mxu1 %v90_v29  ;;  %756 = vmatprep.subr.mxu0 %v461_v30  ;;  %v163_v29 = vld [vmem:[#allocation2 + $0x298] sm:$0xff]  ;;  %v548_v30 = vrot.slane %v1480_v20, %v1654_v54  ;;  %v374_v20 = vld [vmem:[#allocation2 + $0x930] sm:$0xff] }
  0x9c   :  { %894 = vmatprep.subr.mxu1 %v87_v32  ;;  %757 = vmatpush2.msra.mxu0 %v460_v33  ;;  %v562_v32 = vrot.slane %v1481_v21, %v1654_v54  ;;  %v408_v33 = vld [vmem:[#allocation2 + $0xa40] sm:$0xff]  ;;  %v235_v21 = vld [vmem:[#allocation2 + $0x4d8] sm:$0xff] }
  0x9d   :  { %895 = vmatpush1.msra.mxu1 %v86_v34  ;;  %758 = vmatprep.subr.mxu0 %v457_v36  ;;  %v162_v34 = vld [vmem:[#allocation2 + $0x290] sm:$0xff]  ;;  %v405_v36 = vld [vmem:[#allocation2 + $0xa28] sm:$0xff]  ;;  %v400_v54 = vld [vmem:[#allocation2 + $0xa00] sm:$0xff] }
  0x9e   :  { %896 = vmatprep.subr.mxu1 %v83_v37  ;;  %759 = vmatpush2.msra.mxu0 %v456_v38  ;;  %v159_v37 = vld [vmem:[#allocation2 + $0x278] sm:$0xff]  ;;  %v404_v38 = vld [vmem:[#allocation2 + $0xa20] sm:$0xff] }
  0x9f   :  { %897 = vmatpush1.msra.mxu1 %v82_v39  ;;  %760 = vmatprep.subr.mxu0 %v453_v40  ;;  %v158_v39 = vld [vmem:[#allocation2 + $0x270] sm:$0xff]  ;;  %v401_v40 = vld [vmem:[#allocation2 + $0xa08] sm:$0xff] }
  0xa0   :  { %898 = vmatprep.subr.mxu1 %v207_v41  ;;  %761 = vmatpush2.msra.mxu0 %v452_v43  ;;  %v155_v41 = vld [vmem:[#allocation2 + $0x258] sm:$0xff]  ;;  %v1699_v43 = vcombine.high %v548_v30, %v562_v32 }
  0xa1   :  { %899 = vmatpush2.msra.mxu1 %v206_v44  ;;  %762 = vmatprep.subr.mxu0 %v449_v45  ;;  %v1701_v44 = vcombine.low %v548_v30, %v562_v32  ;;  %v154_v45 = vld [vmem:[#allocation2 + $0x250] sm:$0xff]  ;;  %v363_v30 = vld [vmem:[#allocation2 + $0x8d8] sm:$0xff] }
  0xa2   :  { %900 = vmatprep.subr.mxu1 %v203_v46  ;;  %763 = vmatpush2.msra.mxu0 %v448_v47  ;;  %v151_v46 = vld [vmem:[#allocation2 + $0x238] sm:$0xff]  ;;  %v226_v32 = vld [vmem:[#allocation2 + $0x490] sm:$0xff] }
  0xa3   :  { %901 = vmatpush2.msra.mxu1 %v202_v48  ;;  %764 = vmatprep.subr.mxu0 %v445_v49  ;;  %v271_v47 = vld [vmem:[#allocation2 + $0x5f8] sm:$0xff]  ;;  %v150_v48 = vld [vmem:[#allocation2 + $0x230] sm:$0xff] }
  0xa4   :  { %902 = vmatprep.subr.mxu1 %v199_v50  ;;  %765 = vmatpush2.msra.mxu0 %v444_v51  ;;  %v270_v49 = vld [vmem:[#allocation2 + $0x5f0] sm:$0xff]  ;;  %v147_v50 = vld [vmem:[#allocation2 + $0x218] sm:$0xff] }
  0xa5   :  { %903 = vmatpush2.msra.mxu1 %v198_v52  ;;  %766 = vmatprep.subr.mxu0 %v441_v53  ;;  %v267_v51 = vld [vmem:[#allocation2 + $0x5d8] sm:$0xff]  ;;  %v146_v52 = vld [vmem:[#allocation2 + $0x210] sm:$0xff] }
  0xa6   :  { %904 = vmatprep.subr.mxu1 %v195_v55  ;;  %767 = vmatpush2.msra.mxu0 %v440_v56  ;;  %v266_v53 = vld [vmem:[#allocation2 + $0x5d0] sm:$0xff]  ;;  %v263_v55 = vld [vmem:[#allocation2 + $0x5b8] sm:$0xff] }
  0xa7   :  { %905 = vmatpush2.msra.mxu1 %v194_v57  ;;  %768 = vmatprep.subr.mxu0 %v437_v58  ;;  %v399_v56 = vld [vmem:[#allocation2 + $0x9f8] sm:$0xff]  ;;  %v262_v57 = vld [vmem:[#allocation2 + $0x5b0] sm:$0xff] }
  0xa8   :  { %906 = vmatprep.subr.mxu1 %v191_v59  ;;  %769 = vmatpush2.msra.mxu0 %v436_v60  ;;  %v398_v58 = vld [vmem:[#allocation2 + $0x9f0] sm:$0xff]  ;;  %v259_v59 = vld [vmem:[#allocation2 + $0x598] sm:$0xff] }
  0xa9   :  { %907 = vmatpush2.msra.mxu1 %v190_v61  ;;  %770 = vmatprep.subr.mxu0 %v433_v62  ;;  %v395_v60 = vld [vmem:[#allocation2 + $0x9d8] sm:$0xff]  ;;  %v258_v61 = vld [vmem:[#allocation2 + $0x590] sm:$0xff] }
  0xaa   :  { %908 = vmatprep.subr.mxu1 %v187_v63  ;;  %771 = vmatpush2.msra.mxu0 %v432_v0  ;;  %v394_v62 = vld [vmem:[#allocation2 + $0x9d0] sm:$0xff]  ;;  %v255_v63 = vld [vmem:[#allocation2 + $0x578] sm:$0xff] }
  0xab   :  { %909 = vmatpush2.msra.mxu1 %v186_v1  ;;  %772 = vmatprep.subr.mxu0 %v429_v2  ;;  %v391_v0 = vld [vmem:[#allocation2 + $0x9b8] sm:$0xff]  ;;  %v254_v1 = vld [vmem:[#allocation2 + $0x570] sm:$0xff] }
  0xac   :  { %910 = vmatprep.subr.mxu1 %v183_v3  ;;  %773 = vmatpush2.msra.mxu0 %v428_v4  ;;  %v390_v2 = vld [vmem:[#allocation2 + $0x9b0] sm:$0xff]  ;;  %v387_v3 = vld [vmem:[#allocation2 + $0x998] sm:$0xff] }
  0xad   :  { %911 = vmatpush2.msra.mxu1 %v182_v5  ;;  %774 = vmatprep.subr.mxu0 %v425_v6  ;;  %v386_v4 = vld [vmem:[#allocation2 + $0x990] sm:$0xff]  ;;  %v247_v5 = vld [vmem:[#allocation2 + $0x538] sm:$0xff] }
  0xae   :  { %912 = vmatprep.subr.mxu1 %v179_v7  ;;  %775 = vmatpush2.msra.mxu0 %v424_v8  ;;  %v383_v6 = vld [vmem:[#allocation2 + $0x978] sm:$0xff]  ;;  %v246_v7 = vld [vmem:[#allocation2 + $0x530] sm:$0xff] }
  0xaf   :  { %913 = vmatpush2.msra.mxu1 %v178_v9  ;;  %776 = vmatprep.subr.mxu0 %v421_v10  ;;  %v382_v8 = vld [vmem:[#allocation2 + $0x970] sm:$0xff]  ;;  %v243_v9 = vld [vmem:[#allocation2 + $0x518] sm:$0xff] }
  0xb0   :  { %914 = vmatprep.subr.mxu1 %v175_v11  ;;  %777 = vmatpush2.msra.mxu0 %v420_v13  ;;  %v379_v10 = vld [vmem:[#allocation2 + $0x958] sm:$0xff]  ;;  %v242_v11 = vld [vmem:[#allocation2 + $0x510] sm:$0xff] }
  0xb1   :  { %915 = vmatpush2.msra.mxu1 %v174_v14  ;;  %778 = vmatprep.subr.mxu0 %v417_v15  ;;  %v378_v13 = vld [vmem:[#allocation2 + $0x950] sm:$0xff]  ;;  %v239_v14 = vld [vmem:[#allocation2 + $0x4f8] sm:$0xff] }
  0xb2   :  { %916 = vmatprep.subr.mxu1 %v171_v17  ;;  %779 = vmatpush2.msra.mxu0 %v416_v22  ;;  %v375_v15 = vld [vmem:[#allocation2 + $0x938] sm:$0xff]  ;;  %v238_v17 = vld [vmem:[#allocation2 + $0x4f0] sm:$0xff] }
  0xb3   :  { %917 = vmatpush2.msra.mxu1 %v170_v23  ;;  %780 = vmatprep.subr.mxu0 %v413_v24  ;;  %v371_v22 = vld [vmem:[#allocation2 + $0x918] sm:$0xff]  ;;  %v234_v23 = vld [vmem:[#allocation2 + $0x4d0] sm:$0xff] }
  0xb4   :  { %918 = vmatprep.subr.mxu1 %v167_v25  ;;  %781 = vmatpush2.msra.mxu0 %v412_v26  ;;  %v370_v24 = vld [vmem:[#allocation2 + $0x910] sm:$0xff]  ;;  %v231_v25 = vld [vmem:[#allocation2 + $0x4b8] sm:$0xff] }
  0xb5   :  { %919 = vmatpush2.msra.mxu1 %v166_v27  ;;  %782 = vmatprep.subr.mxu0 %v409_v28  ;;  %v367_v26 = vld [vmem:[#allocation2 + $0x8f8] sm:$0xff]  ;;  %v230_v27 = vld [vmem:[#allocation2 + $0x4b0] sm:$0xff] }
  0xb6   :  { %920 = vmatprep.subr.mxu1 %v163_v29  ;;  %783 = vmatpush2.msra.mxu0 %v408_v33  ;;  %v366_v28 = vld [vmem:[#allocation2 + $0x8f0] sm:$0xff]  ;;  %v227_v29 = vld [vmem:[#allocation2 + $0x498] sm:$0xff] }
  0xb7   :  { %921 = vmatpush2.msra.mxu1 %v162_v34  ;;  %784 = vmatprep.subr.mxu0 %v405_v36  ;;  %v362_v33 = vld [vmem:[#allocation2 + $0x8d0] sm:$0xff]  ;;  %v223_v34 = vld [vmem:[#allocation2 + $0x478] sm:$0xff] }
  0xb8   :  { %922 = vmatprep.subr.mxu1 %v159_v37  ;;  %785 = vmatpush2.msra.mxu0 %v404_v38  ;;  %v359_v36 = vld [vmem:[#allocation2 + $0x8b8] sm:$0xff]  ;;  %v222_v37 = vld [vmem:[#allocation2 + $0x470] sm:$0xff] }
  0xb9   :  { %923 = vmatpush2.msra.mxu1 %v158_v39  ;;  %786 = vmatprep.subr.mxu0 %v401_v40  ;;  %v358_v38 = vld [vmem:[#allocation2 + $0x8b0] sm:$0xff]  ;;  %v219_v39 = vld [vmem:[#allocation2 + $0x458] sm:$0xff] }
  0xba   :  { %924 = vmatprep.subr.mxu1 %v155_v41  ;;  %787 = vmatpush2.msra.mxu0 %v400_v54  ;;  %v355_v40 = vld [vmem:[#allocation2 + $0x898] sm:$0xff]  ;;  %v218_v41 = vld [vmem:[#allocation2 + $0x450] sm:$0xff] }
  0xbb   :  { %788 = vmatprep.mubr.f32.mxu0 %v1699_v43  ;;  %925 = vmatpush2.msra.mxu1 %v154_v45  ;;  %v354_v54 = vld [vmem:[#allocation2 + $0x890] sm:$0xff]  ;;  %v215_v45 = vld [vmem:[#allocation2 + $0x438] sm:$0xff] }
  0xbc   :  { %789 = vmatmul.mubr.f32.vlgmr.msra.gmra.mxu0 %v1701_v44  ;;  %926 = vmatprep.subr.mxu1 %v151_v46  ;;  %v351_v46 = vld [vmem:[#allocation2 + $0x878] sm:$0xff] }
  0xbd   :  { %937 = vmatprep.subr.mxu0 %v271_v47  ;;  %927 = vmatpush2.msra.mxu1 %v150_v48  ;;  %v214_v47 = vld [vmem:[#allocation2 + $0x430] sm:$0xff] }
  0xbe   :  { %938 = vmatpush1.msra.mxu0 %v270_v49  ;;  %928 = vmatprep.subr.mxu1 %v147_v50  ;;  %v350_v48 = vld [vmem:[#allocation2 + $0x870] sm:$0xff]  ;;  %v211_v49 = vld [vmem:[#allocation2 + $0x418] sm:$0xff] }
  0xbf   :  { %939 = vmatprep.subr.mxu0 %v267_v51  ;;  %929 = vmatpush2.msra.mxu1 %v146_v52  ;;  %v347_v50 = vld [vmem:[#allocation2 + $0x858] sm:$0xff]  ;;  %v210_v51 = vld [vmem:[#allocation2 + $0x410] sm:$0xff] }
  0xc0   :  { %930 = vmatprep.mubr.f32.mxu1 %v1666_v12  ;;  %940 = vmatpush1.msra.mxu0 %v266_v53  ;;  %v251_v12 = vld [vmem:[#allocation2 + $0x558] sm:$0xff]  ;;  %v346_v52 = vld [vmem:[#allocation2 + $0x850] sm:$0xff] }
  0xc1   :  { %931 = vmatmul.mubr.f32.vlgmr.msra.gmra.mxu1 %v1676_v18  ;;  %941 = vmatprep.subr.mxu0 %v263_v55  ;;  %v250_v18 = vld [vmem:[#allocation2 + $0x550] sm:$0xff]  ;;  %v335_v53 = vld [vmem:[#allocation2 + $0x7f8] sm:$0xff] }
  0xc2   :  { %1008 = vmatprep.subr.mxu1 %v399_v56  ;;  %942 = vmatpush1.msra.mxu0 %v262_v57  ;;  %v343_v55 = vld [vmem:[#allocation2 + $0x838] sm:$0xff]  ;;  %v334_v56 = vld [vmem:[#allocation2 + $0x7f0] sm:$0xff] }
  0xc3   :  { %1009 = vmatpush1.msra.mxu1 %v398_v58  ;;  %943 = vmatprep.subr.mxu0 %v259_v59  ;;  %v342_v57 = vld [vmem:[#allocation2 + $0x830] sm:$0xff]  ;;  %v331_v58 = vld [vmem:[#allocation2 + $0x7d8] sm:$0xff] }
  0xc4   :  { %1010 = vmatprep.subr.mxu1 %v395_v60  ;;  %944 = vmatpush1.msra.mxu0 %v258_v61  ;;  %v339_v59 = vld [vmem:[#allocation2 + $0x818] sm:$0xff]  ;;  %v330_v60 = vld [vmem:[#allocation2 + $0x7d0] sm:$0xff] }
  0xc5   :  { %1011 = vmatpush1.msra.mxu1 %v394_v62  ;;  %945 = vmatprep.subr.mxu0 %v255_v63  ;;  %v338_v61 = vld [vmem:[#allocation2 + $0x810] sm:$0xff]  ;;  %v327_v62 = vld [vmem:[#allocation2 + $0x7b8] sm:$0xff] }
  0xc6   :  { %1012 = vmatprep.subr.mxu1 %v391_v0  ;;  %946 = vmatpush1.msra.mxu0 %v254_v1  ;;  %v463_v63 = vld [vmem:[#allocation2 + $0xbf8] sm:$0xff]  ;;  %v326_v0 = vld [vmem:[#allocation2 + $0x7b0] sm:$0xff] }
  0xc7   :  { %1013 = vmatpush1.msra.mxu1 %v390_v2  ;;  %947 = vmatprep.subr.mxu0 %v251_v12  ;;  %v462_v1 = vld [vmem:[#allocation2 + $0xbf0] sm:$0xff]  ;;  %v323_v2 = vld [vmem:[#allocation2 + $0x798] sm:$0xff] }
  0xc8   :  { %1014 = vmatprep.subr.mxu1 %v387_v3  ;;  %948 = vmatpush1.msra.mxu0 %v250_v18  ;;  %v459_v12 = vld [vmem:[#allocation2 + $0xbd8] sm:$0xff]  ;;  %v322_v3 = vld [vmem:[#allocation2 + $0x790] sm:$0xff] }
  0xc9   :  { %1015 = vmatpush1.msra.mxu1 %v386_v4  ;;  %949 = vmatprep.subr.mxu0 %v247_v5  ;;  %v458_v18 = vld [vmem:[#allocation2 + $0xbd0] sm:$0xff]  ;;  %v319_v4 = vld [vmem:[#allocation2 + $0x778] sm:$0xff] }
  0xca   :  { %1016 = vmatprep.subr.mxu1 %v383_v6  ;;  %950 = vmatpush1.msra.mxu0 %v246_v7  ;;  %v455_v5 = vld [vmem:[#allocation2 + $0xbb8] sm:$0xff]  ;;  %v318_v6 = vld [vmem:[#allocation2 + $0x770] sm:$0xff] }
  0xcb   :  { %1017 = vmatpush1.msra.mxu1 %v382_v8  ;;  %951 = vmatprep.subr.mxu0 %v243_v9  ;;  %v454_v7 = vld [vmem:[#allocation2 + $0xbb0] sm:$0xff]  ;;  %v315_v8 = vld [vmem:[#allocation2 + $0x758] sm:$0xff] }
  0xcc   :  { %1018 = vmatprep.subr.mxu1 %v379_v10  ;;  %952 = vmatpush1.msra.mxu0 %v242_v11  ;;  %v451_v9 = vld [vmem:[#allocation2 + $0xb98] sm:$0xff]  ;;  %v314_v10 = vld [vmem:[#allocation2 + $0x750] sm:$0xff] }
  0xcd   :  { %1019 = vmatpush1.msra.mxu1 %v378_v13  ;;  %953 = vmatprep.subr.mxu0 %v239_v14  ;;  %v450_v11 = vld [vmem:[#allocation2 + $0xb90] sm:$0xff]  ;;  %v311_v13 = vld [vmem:[#allocation2 + $0x738] sm:$0xff] }
  0xce   :  { %1020 = vmatprep.subr.mxu1 %v375_v15  ;;  %954 = vmatpush1.msra.mxu0 %v238_v17  ;;  %v447_v14 = vld [vmem:[#allocation2 + $0xb78] sm:$0xff]  ;;  %v310_v15 = vld [vmem:[#allocation2 + $0x730] sm:$0xff] }
  0xcf   :  { %1021 = vmatpush1.msra.mxu1 %v374_v20  ;;  %955 = vmatprep.subr.mxu0 %v235_v21  ;;  %v446_v17 = vld [vmem:[#allocation2 + $0xb70] sm:$0xff]  ;;  %v307_v20 = vld [vmem:[#allocation2 + $0x718] sm:$0xff] }
  0xd0   :  { %1022 = vmatprep.subr.mxu1 %v371_v22  ;;  %956 = vmatpush1.msra.mxu0 %v234_v23  ;;  %v443_v21 = vld [vmem:[#allocation2 + $0xb58] sm:$0xff]  ;;  %v306_v22 = vld [vmem:[#allocation2 + $0x710] sm:$0xff] }
  0xd1   :  { %1023 = vmatpush1.msra.mxu1 %v370_v24  ;;  %957 = vmatprep.subr.mxu0 %v231_v25  ;;  %v442_v23 = vld [vmem:[#allocation2 + $0xb50] sm:$0xff]  ;;  %v303_v24 = vld [vmem:[#allocation2 + $0x6f8] sm:$0xff] }
  0xd2   :  { %1024 = vmatprep.subr.mxu1 %v367_v26  ;;  %958 = vmatpush1.msra.mxu0 %v230_v27  ;;  %v439_v25 = vld [vmem:[#allocation2 + $0xb38] sm:$0xff]  ;;  %v302_v26 = vld [vmem:[#allocation2 + $0x6f0] sm:$0xff] }
  0xd3   :  { %1025 = vmatpush1.msra.mxu1 %v366_v28  ;;  %959 = vmatprep.subr.mxu0 %v227_v29  ;;  %v438_v27 = vld [vmem:[#allocation2 + $0xb30] sm:$0xff]  ;;  %v299_v28 = vld [vmem:[#allocation2 + $0x6d8] sm:$0xff] }
  0xd4   :  { %1026 = vmatprep.subr.mxu1 %v363_v30  ;;  %960 = vmatpush1.msra.mxu0 %v226_v32  ;;  %v435_v29 = vld [vmem:[#allocation2 + $0xb18] sm:$0xff]  ;;  %v298_v30 = vld [vmem:[#allocation2 + $0x6d0] sm:$0xff] }
  0xd5   :  { %1027 = vmatpush1.msra.mxu1 %v362_v33  ;;  %961 = vmatprep.subr.mxu0 %v223_v34  ;;  %v434_v32 = vld [vmem:[#allocation2 + $0xb10] sm:$0xff]  ;;  %v295_v33 = vld [vmem:[#allocation2 + $0x6b8] sm:$0xff] }
  0xd6   :  { %1028 = vmatprep.subr.mxu1 %v359_v36  ;;  %962 = vmatpush1.msra.mxu0 %v222_v37  ;;  %v431_v34 = vld [vmem:[#allocation2 + $0xaf8] sm:$0xff]  ;;  %v294_v36 = vld [vmem:[#allocation2 + $0x6b0] sm:$0xff] }
  0xd7   :  { %1029 = vmatpush1.msra.mxu1 %v358_v38  ;;  %963 = vmatprep.subr.mxu0 %v219_v39  ;;  %v430_v37 = vld [vmem:[#allocation2 + $0xaf0] sm:$0xff]  ;;  %v291_v38 = vld [vmem:[#allocation2 + $0x698] sm:$0xff] }
  0xd8   :  { %1030 = vmatprep.subr.mxu1 %v355_v40  ;;  %964 = vmatpush1.msra.mxu0 %v218_v41  ;;  %v427_v39 = vld [vmem:[#allocation2 + $0xad8] sm:$0xff]  ;;  %v290_v40 = vld [vmem:[#allocation2 + $0x690] sm:$0xff] }
  0xd9   :  { %1031 = vmatpush1.msra.mxu1 %v354_v54  ;;  %965 = vmatprep.subr.mxu0 %v215_v45  ;;  %v426_v41 = vld [vmem:[#allocation2 + $0xad0] sm:$0xff]  ;;  %v287_v54 = vld [vmem:[#allocation2 + $0x678] sm:$0xff] }
  0xda   :  { %1032 = vmatprep.subr.mxu1 %v351_v46  ;;  %966 = vmatpush1.msra.mxu0 %v214_v47  ;;  %v423_v45 = vld [vmem:[#allocation2 + $0xab8] sm:$0xff]  ;;  %v286_v46 = vld [vmem:[#allocation2 + $0x670] sm:$0xff] }
  0xdb   :  { %1033 = vmatpush1.msra.mxu1 %v350_v48  ;;  %967 = vmatprep.subr.mxu0 %v211_v49  ;;  %v422_v47 = vld [vmem:[#allocation2 + $0xab0] sm:$0xff]  ;;  %v283_v48 = vld [vmem:[#allocation2 + $0x658] sm:$0xff] }
  0xdc   :  { %1034 = vmatprep.subr.mxu1 %v347_v50  ;;  %968 = vmatpush1.msra.mxu0 %v210_v51  ;;  %v419_v49 = vld [vmem:[#allocation2 + $0xa98] sm:$0xff]  ;;  %v282_v50 = vld [vmem:[#allocation2 + $0x650] sm:$0xff] }
  0xdd   :  { %1035 = vmatpush1.msra.mxu1 %v346_v52  ;;  %969 = vmatprep.subr.mxu0 %v335_v53  ;;  %v418_v51 = vld [vmem:[#allocation2 + $0xa90] sm:$0xff]  ;;  %v279_v52 = vld [vmem:[#allocation2 + $0x638] sm:$0xff] }
  0xde   :  { %1036 = vmatprep.subr.mxu1 %v343_v55  ;;  %970 = vmatpush2.msra.mxu0 %v334_v56  ;;  %v415_v53 = vld [vmem:[#allocation2 + $0xa78] sm:$0xff]  ;;  %v278_v55 = vld [vmem:[#allocation2 + $0x630] sm:$0xff] }
  0xdf   :  { %1037 = vmatpush1.msra.mxu1 %v342_v57  ;;  %971 = vmatprep.subr.mxu0 %v331_v58  ;;  %v414_v56 = vld [vmem:[#allocation2 + $0xa70] sm:$0xff]  ;;  %v275_v57 = vld [vmem:[#allocation2 + $0x618] sm:$0xff] }
  0xe0   :  { %1038 = vmatprep.subr.mxu1 %v339_v59  ;;  %972 = vmatpush2.msra.mxu0 %v330_v60  ;;  %v411_v58 = vld [vmem:[#allocation2 + $0xa58] sm:$0xff]  ;;  %v274_v59 = vld [vmem:[#allocation2 + $0x610] sm:$0xff] }
  0xe1   :  { %1039 = vmatpush1.msra.mxu1 %v338_v61  ;;  %973 = vmatprep.subr.mxu0 %v327_v62  ;;  %v410_v60 = vld [vmem:[#allocation2 + $0xa50] sm:$0xff]  ;;  %v407_v61 = vld [vmem:[#allocation2 + $0xa38] sm:$0xff] }
  0xe2   :  { %1040 = vmatprep.subr.mxu1 %v463_v63  ;;  %974 = vmatpush2.msra.mxu0 %v326_v0  ;;  %v471_v62 = vld [vmem:[#allocation2 + $0xc38] sm:$0xff]  ;;  %v406_v63 = vld [vmem:[#allocation2 + $0xa30] sm:$0xff] }
  0xe3   :  { %1041 = vmatpush2.msra.mxu1 %v462_v1  ;;  %975 = vmatprep.subr.mxu0 %v323_v2  ;;  %v470_v0 = vld [vmem:[#allocation2 + $0xc30] sm:$0xff]  ;;  %v403_v1 = vld [vmem:[#allocation2 + $0xa18] sm:$0xff] }
  0xe4   :  { %1042 = vmatprep.subr.mxu1 %v459_v12  ;;  %976 = vmatpush2.msra.mxu0 %v322_v3  ;;  %v467_v2 = vld [vmem:[#allocation2 + $0xc18] sm:$0xff]  ;;  %v402_v12 = vld [vmem:[#allocation2 + $0xa10] sm:$0xff] }
  0xe5   :  { %1043 = vmatpush2.msra.mxu1 %v458_v18  ;;  %977 = vmatprep.subr.mxu0 %v319_v4  ;;  %v466_v3 = vld [vmem:[#allocation2 + $0xc10] sm:$0xff]  ;;  %v1185_v18 = vld [vmem:[#allocation7 + $0xf8] sm:$0xff] }
  0xe6   :  { %1044 = vmatprep.subr.mxu1 %v455_v5  ;;  %978 = vmatpush2.msra.mxu0 %v318_v6  ;;  %v1168_v4 = vld [vmem:[#allocation7 + $0x70] sm:$0xff]  ;;  %v1183_v5 = vld [vmem:[#allocation7 + $0xe8] sm:$0xff]  ;;  %v1217_v6 = vld [vmem:[#allocation7 + $0x1f8] sm:$0xff] }
  0xe7   :  { %1045 = vmatpush2.msra.mxu1 %v454_v7  ;;  %979 = vmatprep.subr.mxu0 %v315_v8  ;;  %v1201_v7 = vld [vmem:[#allocation7 + $0x178] sm:$0xff]  ;;  %v1216_v8 = vld [vmem:[#allocation7 + $0x1f0] sm:$0xff] }
  0xe8   :  { %1046 = vmatprep.subr.mxu1 %v451_v9  ;;  %980 = vmatpush2.msra.mxu0 %v314_v10  ;;  %v1200_v9 = vld [vmem:[#allocation7 + $0x170] sm:$0xff]  ;;  %v1215_v10 = vld [vmem:[#allocation7 + $0x1e8] sm:$0xff] }
  0xe9   :  { %1047 = vmatpush2.msra.mxu1 %v450_v11  ;;  %981 = vmatprep.subr.mxu0 %v311_v13  ;;  %v1181_v11 = vld [vmem:[#allocation7 + $0xd8] sm:$0xff]  ;;  %v1214_v13 = vld [vmem:[#allocation7 + $0x1e0] sm:$0xff] }
  0xea   :  { %1048 = vmatprep.subr.mxu1 %v447_v14  ;;  %982 = vmatpush2.msra.mxu0 %v310_v15  ;;  %v1165_v14 = vld [vmem:[#allocation7 + $0x58] sm:$0xff]  ;;  %v1198_v15 = vld [vmem:[#allocation7 + $0x160] sm:$0xff] }
  0xeb   :  { %1049 = vmatpush2.msra.mxu1 %v446_v17  ;;  %983 = vmatprep.subr.mxu0 %v307_v20  ;;  %v1180_v17 = vld [vmem:[#allocation7 + $0xd0] sm:$0xff]  ;;  %v1213_v20 = vld [vmem:[#allocation7 + $0x1d8] sm:$0xff] }
  0xec   :  { %1050 = vmatprep.subr.mxu1 %v443_v21  ;;  %984 = vmatpush2.msra.mxu0 %v306_v22  ;;  %v1164_v21 = vld [vmem:[#allocation7 + $0x50] sm:$0xff]  ;;  %v1197_v22 = vld [vmem:[#allocation7 + $0x158] sm:$0xff] }
  0xed   :  { %1051 = vmatpush2.msra.mxu1 %v442_v23  ;;  %985 = vmatprep.subr.mxu0 %v303_v24  ;;  %v1179_v23 = vld [vmem:[#allocation7 + $0xc8] sm:$0xff]  ;;  %v1212_v24 = vld [vmem:[#allocation7 + $0x1d0] sm:$0xff] }
  0xee   :  { %1052 = vmatprep.subr.mxu1 %v439_v25  ;;  %986 = vmatpush2.msra.mxu0 %v302_v26  ;;  %v1163_v25 = vld [vmem:[#allocation7 + $0x48] sm:$0xff]  ;;  %v1196_v26 = vld [vmem:[#allocation7 + $0x150] sm:$0xff] }
  0xef   :  { %1053 = vmatpush2.msra.mxu1 %v438_v27  ;;  %987 = vmatprep.subr.mxu0 %v299_v28  ;;  %v1178_v27 = vld [vmem:[#allocation7 + $0xc0] sm:$0xff]  ;;  %v1211_v28 = vld [vmem:[#allocation7 + $0x1c8] sm:$0xff] }
  0xf0   :  { %1054 = vmatprep.subr.mxu1 %v435_v29  ;;  %988 = vmatpush2.msra.mxu0 %v298_v30  ;;  %v1162_v29 = vld [vmem:[#allocation7 + $0x40] sm:$0xff]  ;;  %v1195_v30 = vld [vmem:[#allocation7 + $0x148] sm:$0xff] }
  0xf1   :  { %1055 = vmatpush2.msra.mxu1 %v434_v32  ;;  %989 = vmatprep.subr.mxu0 %v295_v33  ;;  %v1177_v32 = vld [vmem:[#allocation7 + $0xb8] sm:$0xff]  ;;  %v1210_v33 = vld [vmem:[#allocation7 + $0x1c0] sm:$0xff] }
  0xf2   :  { %1056 = vmatprep.subr.mxu1 %v431_v34  ;;  %990 = vmatpush2.msra.mxu0 %v294_v36  ;;  %v1161_v34 = vld [vmem:[#allocation7 + $0x38] sm:$0xff]  ;;  %v1194_v36 = vld [vmem:[#allocation7 + $0x140] sm:$0xff] }
  0xf3   :  { %1057 = vmatpush2.msra.mxu1 %v430_v37  ;;  %991 = vmatprep.subr.mxu0 %v291_v38  ;;  %v1176_v37 = vld [vmem:[#allocation7 + $0xb0] sm:$0xff]  ;;  %v1209_v38 = vld [vmem:[#allocation7 + $0x1b8] sm:$0xff] }
  0xf4   :  { %1058 = vmatprep.subr.mxu1 %v427_v39  ;;  %992 = vmatpush2.msra.mxu0 %v290_v40  ;;  %v1160_v39 = vld [vmem:[#allocation7 + $0x30] sm:$0xff]  ;;  %v1193_v40 = vld [vmem:[#allocation7 + $0x138] sm:$0xff] }
  0xf5   :  { %1059 = vmatpush2.msra.mxu1 %v426_v41  ;;  %993 = vmatprep.subr.mxu0 %v287_v54  ;;  %v1175_v41 = vld [vmem:[#allocation7 + $0xa8] sm:$0xff] }
  0xf6   :  { %1060 = vmatprep.subr.mxu1 %v423_v45  ;;  %994 = vmatpush2.msra.mxu0 %v286_v46  ;;  %v1159_v54 = vld [vmem:[#allocation7 + $0x28] sm:$0xff]  ;;  %v1174_v45 = vld [vmem:[#allocation7 + $0xa0] sm:$0xff] }
  0xf7   :  { %1061 = vmatpush2.msra.mxu1 %v422_v47  ;;  %995 = vmatprep.subr.mxu0 %v283_v48  ;;  %v1158_v46 = vld [vmem:[#allocation7 + $0x20] sm:$0xff]  ;;  %v1173_v47 = vld [vmem:[#allocation7 + $0x98] sm:$0xff] }
  0xf8   :  { %1062 = vmatprep.subr.mxu1 %v419_v49  ;;  %996 = vmatpush2.msra.mxu0 %v282_v50  ;;  %v1157_v48 = vld [vmem:[#allocation7 + $0x18] sm:$0xff]  ;;  %v1172_v49 = vld [vmem:[#allocation7 + $0x90] sm:$0xff] }
  0xf9   :  { %1063 = vmatpush2.msra.mxu1 %v418_v51  ;;  %997 = vmatprep.subr.mxu0 %v279_v52  ;;  %v1156_v50 = vld [vmem:[#allocation7 + $0x10] sm:$0xff]  ;;  %v1171_v51 = vld [vmem:[#allocation7 + $0x88] sm:$0xff] }
  0xfa   :  { %1064 = vmatprep.subr.mxu1 %v415_v53  ;;  %998 = vmatpush2.msra.mxu0 %v278_v55  ;;  %v1155_v52 = vld [vmem:[#allocation7 + $0x8] sm:$0xff]  ;;  %v1170_v53 = vld [vmem:[#allocation7 + $0x80] sm:$0xff] }
  0xfb   :  { %1065 = vmatpush2.msra.mxu1 %v414_v56  ;;  %999 = vmatprep.subr.mxu0 %v275_v57  ;;  %v1154_v55 = vld [vmem:[#allocation7] sm:$0xff]  ;;  %v1208_v56 = vld [vmem:[#allocation7 + $0x1b0] sm:$0xff] }
  0xfc   :  { %1066 = vmatprep.subr.mxu1 %v411_v58  ;;  %1000 = vmatpush2.msra.mxu0 %v274_v59  ;;  %v1192_v57 = vld [vmem:[#allocation7 + $0x130] sm:$0xff]  ;;  %v1207_v58 = vld [vmem:[#allocation7 + $0x1a8] sm:$0xff] }
  0xfd   :  { %1001 = vmatprep.mubr.f32.mxu0 %v1674_v16  ;;  %1067 = vmatpush2.msra.mxu1 %v410_v60  ;;  %v1169_v16 = vld [vmem:[#allocation7 + $0x78] sm:$0xff]  ;;  %v1191_v59 = vld [vmem:[#allocation7 + $0x128] sm:$0xff]  ;;  %v1206_v60 = vld [vmem:[#allocation7 + $0x1a0] sm:$0xff] }
  0xfe   :  { %1002 = vmatmul.mubr.f32.vlgmr.msra.gmra.mxu0 %v1678_v19  ;;  %1068 = vmatprep.subr.mxu1 %v407_v61  ;;  %v1184_v19 = vld [vmem:[#allocation7 + $0xf0] sm:$0xff]  ;;  %v1190_v61 = vld [vmem:[#allocation7 + $0x120] sm:$0xff] }
  0xff   :  { %1107 = vmatprep.subr.mxu0 %v471_v62  ;;  %1069 = vmatpush2.msra.mxu1 %v406_v63  ;;  %v1205_v62 = vld [vmem:[#allocation7 + $0x198] sm:$0xff] }
 0x100   :  { %1108 = vmatpush1.msra.mxu0 %v470_v0  ;;  %1070 = vmatprep.subr.mxu1 %v403_v1  ;;  %v1189_v63 = vld [vmem:[#allocation7 + $0x118] sm:$0xff]  ;;  %v1204_v0 = vld [vmem:[#allocation7 + $0x190] sm:$0xff] }
 0x101   :  { %1109 = vmatprep.subr.mxu0 %v467_v2  ;;  %1071 = vmatpush2.msra.mxu1 %v402_v12  ;;  %v1188_v1 = vld [vmem:[#allocation7 + $0x110] sm:$0xff]  ;;  %v1203_v2 = vld [vmem:[#allocation7 + $0x188] sm:$0xff] }
 0x102   :  { %1072 = vmatprep.mubr.f32.mxu1 %v1699_v43  ;;  %1110 = vmatpush1.msra.mxu0 %v466_v3  ;;  %v1167_v43 = vld [vmem:[#allocation7 + $0x68] sm:$0xff]  ;;  %v1202_v3 = vld [vmem:[#allocation7 + $0x180] sm:$0xff] }
 0x103   :  { %1143 = vmatprep.mubr.f32.mxu0 %v1599_v35  ;;  %1073 = vmatmul.mubr.f32.vlgmr.msra.gmra.mxu1 %v1701_v44  ;;  %v1182_v35 = vld [vmem:[#allocation7 + $0xe0] sm:$0xff]  ;;  %v1187_v12 = vld [vmem:[#allocation7 + $0x108] sm:$0xff] }
 0x104   :  { %1386 = vmatmul.mubr.msk.f32.vlgmr.msra.gmra.mxu0 %vm579_vm0, %v1686_v31  ;;  %1388 = vmatprep.subr.mxu0 %v1185_v18  ;;  %v1166_v44 = vld [vmem:[#allocation7 + $0x60] sm:$0xff]  ;;  %v1199_v31 = vld [vmem:[#allocation7 + $0x168] sm:$0xff] }
 0x105   :  { %1389 = vmatpush3.msra.mxu0 %v1169_v16  ;;  %1423 = vmatprep.subr.mxu1 %v1217_v6  ;;  %v1186_v18 = vld [vmem:[#allocation7 + $0x100] sm:$0xff]  ;;  %v476_v16 = vsub.s32 0, %v1645_v42 }
 0x106   :  { %1390 = vmatprep.subr.mxu0 %v1184_v19  ;;  %1424 = vmatpush3.msra.mxu1 %v1201_v7  ;;  %v472_v19 = vld [vmem:[#allocation5] sm:$0xf] }
 0x107   :  { %1391 = vmatpush3.msra.mxu0 %v1168_v4  ;;  %1425 = vmatprep.subr.mxu1 %v1216_v8  ;;  %v480_v4 = vsub.s32 1, %v1645_v42  ;;  %v477_v6 = vrot.slane %v472_v19, %v476_v16 }
 0x108   :  { %1392 = vmatprep.subr.mxu0 %v1183_v5  ;;  %1426 = vmatpush3.msra.mxu1 %v1200_v9 }
 0x109   :  { %1393 = vmatpush3.msra.mxu0 %v1167_v43  ;;  %1427 = vmatprep.subr.mxu1 %v1215_v10  ;;  %v481_v8 = vrot.slane %v472_v19, %v480_v4 }
 0x10a   :  { %1394 = vmatprep.subr.mxu0 %v1182_v35  ;;  %1428 = vmatpush3.msra.mxu1 %v1199_v31 }
 0x10b   :  { %1395 = vmatpush3.msra.mxu0 %v1166_v44  ;;  %1429 = vmatprep.subr.mxu1 %v1214_v13 }
 0x10c   :  { %1396 = vmatprep.subr.mxu0 %v1181_v11  ;;  %1430 = vmatpush3.msra.mxu1 %v1198_v15 }
 0x10d   :  { %1397 = vmatpush3.msra.mxu0 %v1165_v14  ;;  %1431 = vmatprep.subr.mxu1 %v1213_v20 }
 0x10e   :  { %1398 = vmatprep.subr.mxu0 %v1180_v17  ;;  %1432 = vmatpush3.msra.mxu1 %v1197_v22 }
 0x10f   :  { %1399 = vmatpush3.msra.mxu0 %v1164_v21  ;;  %1433 = vmatprep.subr.mxu1 %v1212_v24 }
 0x110   :  { %1400 = vmatprep.subr.mxu0 %v1179_v23  ;;  %1434 = vmatpush3.msra.mxu1 %v1196_v26  ;;  %v488_v26 = vsub.s32 3, %v1645_v42 }
 0x111   :  { %1401 = vmatpush3.msra.mxu0 %v1163_v25  ;;  %1435 = vmatprep.subr.mxu1 %v1211_v28  ;;  %v484_v25 = vsub.s32 2, %v1645_v42 }
 0x112   :  { %1402 = vmatprep.subr.mxu0 %v1178_v27  ;;  %1436 = vmatpush3.msra.mxu1 %v1195_v30  ;;  %v489_v30 = vrot.slane %v472_v19, %v488_v26 }
 0x113   :  { %1403 = vmatpush3.msra.mxu0 %v1162_v29  ;;  %1437 = vmatprep.subr.mxu1 %v1210_v33  ;;  %v485_v28 = vrot.slane %v472_v19, %v484_v25 }
 0x114   :  { %1404 = vmatprep.subr.mxu0 %v1177_v32  ;;  %1438 = vmatpush3.msra.mxu1 %v1194_v36 }
 0x115   :  { %1405 = vmatpush3.msra.mxu0 %v1161_v34  ;;  %1439 = vmatprep.subr.mxu1 %v1209_v38 }
 0x116   :  { %1406 = vmatprep.subr.mxu0 %v1176_v37  ;;  %1440 = vmatpush3.msra.mxu1 %v1193_v40 }
 0x117   :  { %1407 = vmatpush3.msra.mxu0 %v1160_v39  ;;  %1441 = vmatprep.subr.mxu1 %v1208_v56 }
 0x118   :  { %1408 = vmatprep.subr.mxu0 %v1175_v41  ;;  %1442 = vmatpush3.msra.mxu1 %v1192_v57 }
 0x119   :  { %1409 = vmatpush3.msra.mxu0 %v1159_v54  ;;  %1443 = vmatprep.subr.mxu1 %v1207_v58 }
 0x11a   :  { %1410 = vmatprep.subr.mxu0 %v1174_v45  ;;  %1444 = vmatpush3.msra.mxu1 %v1191_v59 }
 0x11b   :  { %1411 = vmatpush3.msra.mxu0 %v1158_v46  ;;  %1445 = vmatprep.subr.mxu1 %v1206_v60 }
 0x11c   :  { %1412 = vmatprep.subr.mxu0 %v1173_v47  ;;  %1446 = vmatpush3.msra.mxu1 %v1190_v61 }
 0x11d   :  { %1413 = vmatpush3.msra.mxu0 %v1157_v48  ;;  %1447 = vmatprep.subr.mxu1 %v1205_v62 }
 0x11e   :  { %1414 = vmatprep.subr.mxu0 %v1172_v49  ;;  %1448 = vmatpush3.msra.mxu1 %v1189_v63 }
 0x11f   :  { %1415 = vmatpush3.msra.mxu0 %v1156_v50  ;;  %1449 = vmatprep.subr.mxu1 %v1204_v0 }
 0x120   :  { %1416 = vmatprep.subr.mxu0 %v1171_v51  ;;  %1450 = vmatpush3.msra.mxu1 %v1188_v1 }
 0x121   :  { %1417 = vmatpush3.msra.mxu0 %v1155_v52  ;;  %1451 = vmatprep.subr.mxu1 %v1203_v2 }
 0x122   :  { %1418 = vmatprep.subr.mxu0 %v1170_v53  ;;  %1452 = vmatpush3.msra.mxu1 %v1187_v12  ;;  %v1387_v53 = vld [vmem:[#allocation8] ss:$0 sm:$0xff] }
 0x123   :  { %1419 = vmatpush3.msra.mxu0 %v1154_v55  ;;  %1453 = vmatprep.subr.mxu1 %v1202_v3 }
 0x124   :  { %1454 = vmatpush3.msra.mxu1 %v1186_v18 }
 0x139   :  { %v648_v5 = vpop.f32.mrf.mxu0 }
 0x13a   :  { %v719_v7 = vpop.f32.mrf.mxu1  ;;  %v649_v9 = vadd.f32 %v648_v5, %v477_v6 }
 0x13b   :  { %v650_v43 = vpop.f32.mrf.mxu0 }
 0x13c   :  { %v721_v35 = vpop.f32.mrf.mxu1  ;;  %v651_v10 = vadd.f32 %v650_v43, %v481_v8  ;;  %v720_v44 = vadd.f32 %v719_v7, %v649_v9 }
 0x13e   :  { %v722_v13 = vadd.f32 %v721_v35, %v651_v10 }
 0x13f   :  { %v861_v31 = vpop.f32.mrf.mxu1 }
 0x141   :  { %v863_v20 = vpop.f32.mrf.mxu1 }
 0x17c   :  { %v790_v11 = vpop.f32.mrf.mxu0 }
 0x17d   :  { %v791_v14 = vadd.f32 %v790_v11, %v720_v44 }
 0x17e   :  { %v792_v15 = vpop.f32.mrf.mxu0 }
 0x17f   :  { %v793_v17 = vadd.f32 %v792_v15, %v722_v13  ;;  %v862_v21 = vadd.f32 %v861_v31, %v791_v14 }
 0x181   :  { %v864_v22 = vadd.f32 %v863_v20, %v793_v17  ;;  %v1150_v24 = vmax.f32 %v862_v21, 0.0  ;;  %v932_v27 = vpop.f32.mrf.mxu1 }
 0x182   :  { %v933_v34 = vadd.f32 %v932_v27, %v485_v28 }
 0x183   :  { %v1151_v23 = vmax.f32 %v864_v22, 0.0  ;;  %v934_v32 = vpop.f32.mrf.mxu1 }
 0x184   :  { %v935_v36 = vadd.f32 %v934_v32, %v489_v30 }
 0x185   :  { %1289 = vmatprep.mubr.f32.mxu0 %v1151_v23 }
 0x186   :  { %1290 = vmatmul.mubr.f32.vlgmr.msra.gmra.mxu0 %v1150_v24 }
 0x1be   :  { %v1003_v29 = vpop.f32.mrf.mxu0 }
 0x1bf   :  { %v1004_v37 = vadd.f32 %v1003_v29, %v933_v34 }
 0x1c0   :  { %v1005_v33 = vpop.f32.mrf.mxu0 }
 0x1c1   :  { %v1006_v40 = vadd.f32 %v1005_v33, %v935_v36 }
 0x1c3   :  { %v1074_v38 = vpop.f32.mrf.mxu1 }
 0x1c4   :  { %v1145_v39 = vpop.f32.mrf.mxu0  ;;  %v1075_v41 = vadd.f32 %v1074_v38, %v1004_v37 }
 0x1c5   :  { %v1076_v54 = vpop.f32.mrf.mxu1 }
 0x1c6   :  { %v1077_v45 = vadd.f32 %v1076_v54, %v1006_v40  ;;  %v1146_v46 = vadd.f32 %v1145_v39, %v1075_v41  ;;  %v1147_v47 = vpop.f32.mrf.mxu0 }
 0x1c8   :  { %v1148_v48 = vadd.f32 %v1147_v47, %v1077_v45  ;;  %v1152_v42 = vmax.f32 %v1146_v46, 0.0 }
 0x1ca   :  { %v1153_v49 = vmax.f32 %v1148_v48, 0.0 }
 0x1cc   :  { %1359 = vmatprep.mubr.f32.mxu1 %v1153_v49 }
 0x1cd   :  { %1360 = vmatmul.mubr.f32.vlgmr.msra.gmra.mxu1 %v1152_v42 }
 0x246   :  { %v1420_v50 = vpop.f32.mrf.mxu0 }
 0x248   :  { %v1421_v51 = vpop.f32.mrf.mxu0 }
 0x249   :  { %v1422_v52 = vadd.f32 %v1421_v51, %v1420_v50 }
 0x24b   :  { %v1292_v57 = vadd.f32 %v1422_v52, %v1387_v53 }
 0x28d   :  { %v1455_v55 = vpop.f32.mrf.mxu1 }
 0x28f   :  { %v1456_v56 = vpop.f32.mrf.mxu1 }
 0x290   :  { %v1457_v58 = vadd.f32 %v1456_v56, %v1455_v55 }
 0x292   :  { %v1362_v59 = vadd.f32 %v1457_v58, %v1292_v57 }
 0x294   :  { %1365 = vst [vmem:[#allocation10] sm:$0xff] %v1362_v59 }
 0x295   :  { %1370 = vsyncadd [#allocation4], 96  ;;  %s1600_s0 = smov [#allocation10]  }
 0x296   :  { %s1371_s6 = sshll.u32 %s1600_s0, 4  ;;  %s1372_s6 = int_to_ptr.vmem [resolvable:$true] %s1371_s6 }
 0x297   :  { %s1562_s7 = scalar_lea.vmem %s1372_s6, 32  ;;  %s1566_s2 = scalar_lea.vmem %s1372_s6, 128 }
 0x298   :  { %p1563_p6 = scmp.ne.s32.totalorder %s1372_s6, %s1562_s7  ;;  %p1567_p7 = scmp.lt.s32.totalorder %s1372_s6, %s1372_s6 }
 0x299   :  { %p1568_p8 = scmp.lt.s32.totalorder %s1566_s2, %s1562_s7 }
 0x29b   :  { %p1569_p9 = por %p1568_p8, %p1567_p7 }
 0x29d   :  { %p1570_p10 = pnand %p1569_p9, %p1563_p6 }
 0x29f   :  { %1573 = shalt.err (!%p1570_p10)
}
 0x2a0   :  { %s1601_s8 = smov 2  }
 0x2a1   :  { %1377 = dma.vmem_to_hbm [thread:$0]  %s1372_s6, 32, %s1728_s5, [#allocation4], %s1593_s27, %s1593_s27, %s1601_s8  }
 0x2a2   :  { %1588 = dma.done.wait [#allocation4], 128  }
 0x2a3   :  { %1589 = vsyncadd [#allocation4], 4294967168 }
 0x2a4   :  { %1381 = vsyncpa [#allocation3], 1 }
 0x2a5   :  { %1382 = vsyncpa [#allocation6], 1 }
 0x2a6   :  { %1383 = vsyncpa [#allocation9], 1 }
 0x2a7   :  { %1384 = vsyncpa [#allocation4], 1 }

</bundles_post_ra>
